<compile_context>
chip_gen: v7x
topology: tpu7x:2x2x1
jax: 0.10.0
libtpu: 0.0.40
codegen_flags: <defaults>
</compile_context>

<pallas_src>
import functools
import inspect

import jax
import jax.numpy as jnp
from jax.experimental import pallas as pl
from jax.experimental.pallas import tpu as pltpu


# Conservative on-chip budget for the fused-resident path: below v7x's 64 MiB physical
# VMEM (and well below v5e/v6e's 128 MiB), leaving headroom for Mosaic internal scratch.
_VMEM_BUDGET_BYTES = 48 * 1024 * 1024
_VMEM_MARGIN_BYTES = 4 * 1024 * 1024


def _round_up(n, m):
    return (n + m - 1) // m * m


def _cdiv(a, b):
    return (a + b - 1) // b


def _supports_single_buffering():
    """API/feature check for pipeline_mode=pl.Buffered(...) on BlockSpec."""
    if not hasattr(pl, "Buffered"):
        return False
    try:
        return "pipeline_mode" in inspect.signature(pl.BlockSpec).parameters
    except (TypeError, ValueError):
        return False


def amlp_kernel(x_ref, g_ref, b_ref,
                w_in_ref, b_in_ref,
                w_hid_ref, b_hid_ref,
                w_out_ref, b_out_ref,
                o_ref, *, compute_dtype):
    # --- LayerNorm over the last dim (D_in), eps = 1e-5, in f32 ---
    x = x_ref[...].astype(jnp.float32)
    mu = jnp.mean(x, axis=-1, keepdims=True)
    var = jnp.mean(jnp.square(x - mu), axis=-1, keepdims=True)
    xn = (x - mu) * jax.lax.rsqrt(var + 1e-5)
    xn = xn * g_ref[...].astype(jnp.float32) + b_ref[...].astype(jnp.float32)

    # --- fc_in + ReLU: bf16 MXU inputs, f32 accumulation, f32 epilogue ---
    h = jnp.dot(xn.astype(compute_dtype), w_in_ref[...].astype(compute_dtype),
                preferred_element_type=jnp.float32)
    h = jnp.maximum(h + b_in_ref[...], 0.0)

    # --- fc_hid (Linear + ReLU) ---
    h = jnp.dot(h.astype(compute_dtype), w_hid_ref[...].astype(compute_dtype),
                preferred_element_type=jnp.float32)
    h = jnp.maximum(h + b_hid_ref[...], 0.0)

    # --- fc_out ---
    o = jnp.dot(h.astype(compute_dtype), w_out_ref[...].astype(compute_dtype),
                preferred_element_type=jnp.float32)
    o = o + b_out_ref[...]
    o_ref[...] = o.astype(o_ref.dtype)


def _const_bytes(d_in, d_hid, d_out, w_itemsize):
    # Weights + biases + LN affine (biases / LN affine kept in f32).
    weights = (d_in * d_hid + d_hid * d_hid + d_hid * d_out) * w_itemsize
    vectors = (2 * d_in + 2 * d_hid + d_out) * 4
    return weights + vectors


def _per_row_bytes(d_in, d_hid, d_out, x_itemsize, out_itemsize):
    # Double-buffered streamed x / out tiles plus ~4 live f32 row-tile intermediates
    # (x_f32 / xn / h / o during the epilogue).
    return (2 * d_in * x_itemsize
            + 2 * d_out * out_itemsize
            + 4 * 4 * max(d_in, d_hid, d_out))


def _max_tile_rows(d_in, d_hid, d_out, x_itemsize, out_itemsize, w_itemsize,
                   requested_tile, row_align):
    const = _const_bytes(d_in, d_hid, d_out, w_itemsize)
    per_row = _per_row_bytes(d_in, d_hid, d_out, x_itemsize, out_itemsize)
    avail = _VMEM_BUDGET_BYTES - const
    if avail < per_row * row_align:
        # TODO(synk): weight (K/N) tiling grid axis for weights larger than the fused-
        # resident VMEM budget; required for v7x (64 MiB VMEM) once d_hid grows.
        raise ValueError(
            "AMLP weights (%d bytes) do not fit the fused-resident VMEM budget "
            "(%d bytes); d_hid tiling is not implemented." % (const, _VMEM_BUDGET_BYTES))
    fit = max(row_align, (avail // per_row) // row_align * row_align)
    return min(_round_up(max(int(requested_tile), row_align), row_align), fit)


def _choose_tiling(rows, max_tile, row_align):
    """Pick (tile, padded_rows) with bounded padding waste and >=2 grid steps if possible."""
    padded = _round_up(max(rows, 1), row_align)
    n_steps = max(1, _cdiv(padded, max_tile))
    if n_steps == 1 and padded >= 2 * row_align:
        n_steps = 2  # keep both v7x TensorCores busy via the "parallel" row axis
    tile = _round_up(_cdiv(padded, n_steps), row_align)
    return tile, tile * n_steps


def _amlp_pallas_call(x2d, params, tile, compute_dtype, single_buffer_consts):
    rows, d_in = x2d.shape
    d_hid = params["w_in"].shape[1]
    d_out = params["w_out"].shape[1]
    assert rows % tile == 0

    grid = (rows // tile,)
    full = lambda i: (0, 0)          # constants: same full block every grid step
    rowtile = lambda i: (i, 0)       # row-tiled tensors

    if single_buffer_consts:
        # Constant index_map -> no re-DMA needed; request a single VMEM buffer.
        const = lambda shape: pl.BlockSpec(shape, full,
                                           pipeline_mode=pl.Buffered(buffer_count=1))
        const_buffers = 1
    else:
        const = lambda shape: pl.BlockSpec(shape, full)
        const_buffers = 2

    in_specs = [
        pl.BlockSpec((tile, d_in), rowtile),        # x
        const((1, d_in)),                           # ln gamma
        const((1, d_in)),                           # ln beta
        const((d_in, d_hid)),                       # fc_in weight
        const((1, d_hid)),                          # fc_in bias
        const((d_hid, d_hid)),                      # fc_hid weight
        const((1, d_hid)),                          # fc_hid bias
        const((d_hid, d_out)),                      # fc_out weight
        const((1, d_out)),                          # fc_out bias
    ]

    args = (x2d,
            params["ln_g"], params["ln_b"],
            params["w_in"], params["b_in"],
            params["w_hid"], params["b_hid"],
            params["w_out"], params["b_out"])

    out_itemsize = jnp.dtype(x2d.dtype).itemsize
    w_itemsize = jnp.dtype(params["w_in"].dtype).itemsize

    # Explicit scoped-VMEM limit sized from the actual footprint (feedback item #1).
    footprint = (_const_bytes(d_in, d_hid, d_out, w_itemsize) * const_buffers
                 + tile * _per_row_bytes(d_in, d_hid, d_out,
                                         x2d.dtype.itemsize, out_itemsize))
    vmem_limit = int(min(max(footprint + _VMEM_MARGIN_BYTES, 16 * 1024 * 1024),
                         64 * 1024 * 1024))

    flops = 2 * rows * (d_in * d_hid + d_hid * d_hid + d_hid * d_out)
    bytes_accessed = sum(int(a.size) * a.dtype.itemsize for a in args)
    bytes_accessed += rows * d_out * out_itemsize

    return pl.pallas_call(
        functools.partial(amlp_kernel, compute_dtype=compute_dtype),
        out_shape=jax.ShapeDtypeStruct((rows, d_out), x2d.dtype),
        grid_spec=pltpu.PrefetchScalarGridSpec(
            num_scalar_prefetch=0,
            grid=grid,
            in_specs=in_specs,
            out_specs=pl.BlockSpec((tile, d_out), rowtile),
        ),
        compiler_params=pltpu.CompilerParams(
            dimension_semantics=("parallel",),
            vmem_limit_bytes=vmem_limit),
        cost_estimate=pl.CostEstimate(
            flops=flops, transcendentals=0, bytes_accessed=bytes_accessed),
    )(*args)


def amlp_forward(x, params, *, tile_rows=512, compute_dtype=jnp.bfloat16):
    """x: (..., D_in). params: dict of weights. Returns (..., D_out) in x.dtype."""
    *lead, d_in = x.shape
    d_hid = params["w_in"].shape[1]
    d_out = params["w_out"].shape[1]

    x2d = x.reshape(-1, d_in)
    rows = x2d.shape[0]

    # Sublane alignment: 8 rows for 4-byte x, 16 for 2-byte (bf16) x.
    row_align = 8 if x2d.dtype.itemsize >= 4 else 16

    max_tile = _max_tile_rows(d_in, d_hid, d_out,
                              x2d.dtype.itemsize, x2d.dtype.itemsize,
                              jnp.dtype(params["w_in"].dtype).itemsize,
                              tile_rows, row_align)
    tile, padded_rows = _choose_tiling(rows, max_tile, row_align)
    if padded_rows != rows:
        x2d = jnp.pad(x2d, ((0, padded_rows - rows), (0, 0)))

    single_buffer = _supports_single_buffering()
    out2d = _amlp_pallas_call(x2d, params, tile, compute_dtype, single_buffer)

    out2d = out2d[:rows]
    return out2d.reshape(*lead, d_out)


def amlp_reference(x, params, compute_dtype=jnp.bfloat16):
    """Pure-JAX reference mirroring the kernel numerics (f32 LN, bf16 matmul inputs)."""
    *lead, d_in = x.shape
    d_out = params["w_out"].shape[1]
    xf = x.reshape(-1, d_in).astype(jnp.float32)
    mu = jnp.mean(xf, axis=-1, keepdims=True)
    var = jnp.mean(jnp.square(xf - mu), axis=-1, keepdims=True)
    xn = (xf - mu) * jax.lax.rsqrt(var + 1e-5)
    xn = xn * params["ln_g"].astype(jnp.float32) + params["ln_b"].astype(jnp.float32)
    h = jnp.dot(xn.astype(compute_dtype), params["w_in"].astype(compute_dtype),
                preferred_element_type=jnp.float32) + params["b_in"]
    h = jnp.maximum(h, 0.0)
    h = jnp.dot(h.astype(compute_dtype), params["w_hid"].astype(compute_dtype),
                preferred_element_type=jnp.float32) + params["b_hid"]
    h = jnp.maximum(h, 0.0)
    o = jnp.dot(h.astype(compute_dtype), params["w_out"].astype(compute_dtype),
                preferred_element_type=jnp.float32) + params["b_out"]
    return o.astype(x.dtype).reshape(*lead, d_out)


def init_params(key, d_in, d_hid, d_out, weight_dtype=jnp.bfloat16):
    # Mirrors AMLP.init_weights: trunc_normal(std=0.02) weights (approximated by
    # normal*0.02), zero biases, LayerNorm weight=1 / bias=0.  Weights stored in bf16
    # (MXU-native on v6e/v7x, halves VMEM/HBM traffic); biases & LN affine kept in f32.
    k1, k2, k3 = jax.random.split(key, 3)
    return {
        "ln_g": jnp.ones((1, d_in), jnp.float32),
        "ln_b": jnp.zeros((1, d_in), jnp.float32),
        "w_in": (jax.random.normal(k1, (d_in, d_hid)) * 0.02).astype(weight_dtype),
        "b_in": jnp.zeros((1, d_hid), jnp.float32),
        "w_hid": (jax.random.normal(k2, (d_hid, d_hid)) * 0.02).astype(weight_dtype),
        "b_hid": jnp.zeros((1, d_hid), jnp.float32),
        "w_out": (jax.random.normal(k3, (d_hid, d_out)) * 0.02).astype(weight_dtype),
        "b_out": jnp.zeros((1, d_out), jnp.float32),
    }


if __name__ == "__main__":
    # Small but TPU-friendly shapes: lane-dense feature dims (multiples of 128) and
    # batch*seq = 512 rows -> two 256-row grid steps (both v7x TCs busy, zero padding).
    batch, seq = 2, 256
    D_in, D_hid, D_out = 128, 256, 128

    key = jax.random.PRNGKey(0)
    kx, kp = jax.random.split(key)
    x = jax.random.normal(kx, (batch, seq, D_in), dtype=jnp.float32)
    params = init_params(kp, D_in, D_hid, D_out)

    out = amlp_forward(x, params, tile_rows=512)
    jax.block_until_ready(out)

    ref = amlp_reference(x, params)
    assert out.shape == (batch, seq, D_out)
    assert jnp.allclose(out, ref, atol=2e-4, rtol=2e-2), "mismatch vs JAX reference"

    # Exercise the remainder path (rows not a multiple of the sublane group).
    x_odd = x.reshape(-1, D_in)[:301].reshape(1, 301, D_in)
    out_odd = amlp_forward(x_odd, params)
    jax.block_until_ready(out_odd)
    ref_odd = amlp_reference(x_odd, params)
    assert jnp.allclose(out_odd, ref_odd, atol=2e-4, rtol=2e-2), "remainder mismatch"

    print("KERNEL_OK")
</pallas_src>

<mosaic_0001>
module attributes {stable_mosaic.version = 11 : i64} {
  func.func @amlp_kernel(%arg0: i32, %arg1: memref<256x128xf32, #tpu.memory_space<vmem>>, %arg2: memref<1x128xf32, #tpu.memory_space<vmem>>, %arg3: memref<1x128xf32, #tpu.memory_space<vmem>>, %arg4: memref<128x256xbf16, #tpu.memory_space<vmem>>, %arg5: memref<1x256xf32, #tpu.memory_space<vmem>>, %arg6: memref<256x256xbf16, #tpu.memory_space<vmem>>, %arg7: memref<1x256xf32, #tpu.memory_space<vmem>>, %arg8: memref<256x128xbf16, #tpu.memory_space<vmem>>, %arg9: memref<1x128xf32, #tpu.memory_space<vmem>>, %arg10: memref<256x128xf32, #tpu.memory_space<vmem>>) attributes {dimension_semantics = [#tpu.dimension_semantics<parallel>], iteration_bounds = array<i64: 2>, scalar_prefetch = 0 : i64, scratch_operands = 0 : i64, tpu.core_type = #tpu.core_type<tc>, window_params = [{transform_indices = @transform_0, window_bounds = array<i64: 256, 128>}, {pipeline_mode = #tpu.pipeline_mode<synchronous>, transform_indices = @transform_1, window_bounds = array<i64: 1, 128>}, {pipeline_mode = #tpu.pipeline_mode<synchronous>, transform_indices = @transform_2, window_bounds = array<i64: 1, 128>}, {pipeline_mode = #tpu.pipeline_mode<synchronous>, transform_indices = @transform_3, window_bounds = array<i64: 128, 256>}, {pipeline_mode = #tpu.pipeline_mode<synchronous>, transform_indices = @transform_4, window_bounds = array<i64: 1, 256>}, {pipeline_mode = #tpu.pipeline_mode<synchronous>, transform_indices = @transform_5, window_bounds = array<i64: 256, 256>}, {pipeline_mode = #tpu.pipeline_mode<synchronous>, transform_indices = @transform_6, window_bounds = array<i64: 1, 256>}, {pipeline_mode = #tpu.pipeline_mode<synchronous>, transform_indices = @transform_7, window_bounds = array<i64: 256, 128>}, {pipeline_mode = #tpu.pipeline_mode<synchronous>, transform_indices = @transform_8, window_bounds = array<i64: 1, 128>}, {transform_indices = @transform_9, window_bounds = array<i64: 256, 128>}]} {
    %c0 = arith.constant 0 : index
    %c0_0 = arith.constant 0 : index
    %0 = vector.load %arg1[%c0, %c0_0] : memref<256x128xf32, #tpu.memory_space<vmem>>, vector<256x128xf32>
    %cst = arith.constant dense<0.000000e+00> : vector<256xf32>
    %1 = vector.multi_reduction <add>, %0, %cst [1] : vector<256x128xf32> to vector<256xf32>
    %2 = vector.shape_cast %1 : vector<256xf32> to vector<256x1xf32>
    %cst_1 = arith.constant 1.280000e+02 : f32
    %3 = vector.broadcast %cst_1 : f32 to vector<256x1xf32>
    %4 = arith.divf %2, %3 : vector<256x1xf32>
    %5 = vector.broadcast %4 : vector<256x1xf32> to vector<256x128xf32>
    %6 = arith.subf %0, %5 : vector<256x128xf32>
    %7 = arith.mulf %6, %6 : vector<256x128xf32>
    %cst_2 = arith.constant dense<0.000000e+00> : vector<256xf32>
    %8 = vector.multi_reduction <add>, %7, %cst_2 [1] : vector<256x128xf32> to vector<256xf32>
    %9 = vector.shape_cast %8 : vector<256xf32> to vector<256x1xf32>
    %cst_3 = arith.constant 1.280000e+02 : f32
    %10 = vector.broadcast %cst_3 : f32 to vector<256x1xf32>
    %11 = arith.divf %9, %10 : vector<256x1xf32>
    %12 = vector.broadcast %4 : vector<256x1xf32> to vector<256x128xf32>
    %13 = arith.subf %0, %12 : vector<256x128xf32>
    %cst_4 = arith.constant 9.99999974E-6 : f32
    %14 = vector.broadcast %cst_4 : f32 to vector<256x1xf32>
    %15 = arith.addf %11, %14 : vector<256x1xf32>
    %16 = math.rsqrt %15 : vector<256x1xf32>
    %17 = vector.broadcast %16 : vector<256x1xf32> to vector<256x128xf32>
    %18 = arith.mulf %13, %17 : vector<256x128xf32>
    %c0_5 = arith.constant 0 : index
    %c0_6 = arith.constant 0 : index
    %19 = vector.load %arg2[%c0_5, %c0_6] : memref<1x128xf32, #tpu.memory_space<vmem>>, vector<1x128xf32>
    %20 = vector.broadcast %19 : vector<1x128xf32> to vector<256x128xf32>
    %21 = arith.mulf %18, %20 : vector<256x128xf32>
    %c0_7 = arith.constant 0 : index
    %c0_8 = arith.constant 0 : index
    %22 = vector.load %arg3[%c0_7, %c0_8] : memref<1x128xf32, #tpu.memory_space<vmem>>, vector<1x128xf32>
    %23 = vector.broadcast %22 : vector<1x128xf32> to vector<256x128xf32>
    %24 = arith.addf %21, %23 : vector<256x128xf32>
    %25 = arith.truncf %24 : vector<256x128xf32> to vector<256x128xbf16>
    %c0_9 = arith.constant 0 : index
    %c0_10 = arith.constant 0 : index
    %26 = vector.load %arg4[%c0_9, %c0_10] : memref<128x256xbf16, #tpu.memory_space<vmem>>, vector<128x256xbf16>
    %cst_11 = arith.constant dense<0.000000e+00> : vector<256x256xf32>
    %27 = tpu.matmul %25, %26, %cst_11 {dimension_numbers = #tpu.dot_dimension_numbers<[1], [0], [0], [1], [0, 0, 1, 1], [], []>} : vector<256x128xbf16>, vector<128x256xbf16>, vector<256x256xf32> -> vector<256x256xf32>
    %c0_12 = arith.constant 0 : index
    %c0_13 = arith.constant 0 : index
    %28 = vector.load %arg5[%c0_12, %c0_13] : memref<1x256xf32, #tpu.memory_space<vmem>>, vector<1x256xf32>
    %29 = vector.broadcast %28 : vector<1x256xf32> to vector<256x256xf32>
    %30 = arith.addf %27, %29 : vector<256x256xf32>
    %cst_14 = arith.constant 0.000000e+00 : f32
    %31 = vector.broadcast %cst_14 : f32 to vector<256x256xf32>
    %32 = arith.maximumf %30, %31 : vector<256x256xf32>
    %33 = arith.truncf %32 : vector<256x256xf32> to vector<256x256xbf16>
    %c0_15 = arith.constant 0 : index
    %c0_16 = arith.constant 0 : index
    %34 = vector.load %arg6[%c0_15, %c0_16] : memref<256x256xbf16, #tpu.memory_space<vmem>>, vector<256x256xbf16>
    %cst_17 = arith.constant dense<0.000000e+00> : vector<256x256xf32>
    %35 = tpu.matmul %33, %34, %cst_17 {dimension_numbers = #tpu.dot_dimension_numbers<[1], [0], [0], [1], [0, 0, 1, 1], [], []>} : vector<256x256xbf16>, vector<256x256xbf16>, vector<256x256xf32> -> vector<256x256xf32>
    %c0_18 = arith.constant 0 : index
    %c0_19 = arith.constant 0 : index
    %36 = vector.load %arg7[%c0_18, %c0_19] : memref<1x256xf32, #tpu.memory_space<vmem>>, vector<1x256xf32>
    %37 = vector.broadcast %36 : vector<1x256xf32> to vector<256x256xf32>
    %38 = arith.addf %35, %37 : vector<256x256xf32>
    %cst_20 = arith.constant 0.000000e+00 : f32
    %39 = vector.broadcast %cst_20 : f32 to vector<256x256xf32>
    %40 = arith.maximumf %38, %39 : vector<256x256xf32>
    %41 = arith.truncf %40 : vector<256x256xf32> to vector<256x256xbf16>
    %c0_21 = arith.constant 0 : index
    %c0_22 = arith.constant 0 : index
    %42 = vector.load %arg8[%c0_21, %c0_22] : memref<256x128xbf16, #tpu.memory_space<vmem>>, vector<256x128xbf16>
    %cst_23 = arith.constant dense<0.000000e+00> : vector<256x128xf32>
    %43 = tpu.matmul %41, %42, %cst_23 {dimension_numbers = #tpu.dot_dimension_numbers<[1], [0], [0], [1], [0, 0, 1, 1], [], []>} : vector<256x256xbf16>, vector<256x128xbf16>, vector<256x128xf32> -> vector<256x128xf32>
    %c0_24 = arith.constant 0 : index
    %c0_25 = arith.constant 0 : index
    %44 = vector.load %arg9[%c0_24, %c0_25] : memref<1x128xf32, #tpu.memory_space<vmem>>, vector<1x128xf32>
    %45 = vector.broadcast %44 : vector<1x128xf32> to vector<256x128xf32>
    %46 = arith.addf %43, %45 : vector<256x128xf32>
    %c0_26 = arith.constant 0 : index
    %c0_27 = arith.constant 0 : index
    %47 = vector.load %arg10[%c0_26, %c0_27] : memref<256x128xf32, #tpu.memory_space<vmem>>, vector<256x128xf32>
    tpu.vector_store %arg10[%c0_26, %c0_27], %46 {strides = array<i32>} : memref<256x128xf32, #tpu.memory_space<vmem>>, vector<256x128xf32>,
    return
  }
  func.func @transform_0(%arg0: i32) -> (i32, i32) {
    %c0_i32 = arith.constant 0 : i32
    %c0_i32_0 = arith.constant 0 : i32
    return %arg0, %c0_i32 : i32, i32
  }
  func.func @transform_1(%arg0: i32) -> (i32, i32) {
    %c0_i32 = arith.constant 0 : i32
    %c0_i32_0 = arith.constant 0 : i32
    %c0_i32_1 = arith.constant 0 : i32
    return %c0_i32, %c0_i32_0 : i32, i32
  }
  func.func @transform_2(%arg0: i32) -> (i32, i32) {
    %c0_i32 = arith.constant 0 : i32
    %c0_i32_0 = arith.constant 0 : i32
    %c0_i32_1 = arith.constant 0 : i32
    return %c0_i32, %c0_i32_0 : i32, i32
  }
  func.func @transform_3(%arg0: i32) -> (i32, i32) {
    %c0_i32 = arith.constant 0 : i32
    %c0_i32_0 = arith.constant 0 : i32
    %c0_i32_1 = arith.constant 0 : i32
    return %c0_i32, %c0_i32_0 : i32, i32
  }
  func.func @transform_4(%arg0: i32) -> (i32, i32) {
    %c0_i32 = arith.constant 0 : i32
    %c0_i32_0 = arith.constant 0 : i32
    %c0_i32_1 = arith.constant 0 : i32
    return %c0_i32, %c0_i32_0 : i32, i32
  }
  func.func @transform_5(%arg0: i32) -> (i32, i32) {
    %c0_i32 = arith.constant 0 : i32
    %c0_i32_0 = arith.constant 0 : i32
    %c0_i32_1 = arith.constant 0 : i32
    return %c0_i32, %c0_i32_0 : i32, i32
  }
  func.func @transform_6(%arg0: i32) -> (i32, i32) {
    %c0_i32 = arith.constant 0 : i32
    %c0_i32_0 = arith.constant 0 : i32
    %c0_i32_1 = arith.constant 0 : i32
    return %c0_i32, %c0_i32_0 : i32, i32
  }
  func.func @transform_7(%arg0: i32) -> (i32, i32) {
    %c0_i32 = arith.constant 0 : i32
    %c0_i32_0 = arith.constant 0 : i32
    %c0_i32_1 = arith.constant 0 : i32
    return %c0_i32, %c0_i32_0 : i32, i32
  }
  func.func @transform_8(%arg0: i32) -> (i32, i32) {
    %c0_i32 = arith.constant 0 : i32
    %c0_i32_0 = arith.constant 0 : i32
    %c0_i32_1 = arith.constant 0 : i32
    return %c0_i32, %c0_i32_0 : i32, i32
  }
  func.func @transform_9(%arg0: i32) -> (i32, i32) {
    %c0_i32 = arith.constant 0 : i32
    %c0_i32_0 = arith.constant 0 : i32
    return %arg0, %c0_i32 : i32, i32
  }
}

</mosaic_0001>

<bundles_post_ra>
// kernel: tpu_custom_call.1
= control target key start
LH: loop header
LB: loop body
LE: loop exit
PB: predicated region body
PF: predicated region fallthrough
CT: control target
= control target key end

     0   :  { %s3810_s0 = inlined_call_operand.hbm [shape: f32[512,128], index: 0, kind: input, shape index: {}]   ;;  %s3811_s1 = inlined_call_operand.vmem [shape: f32[1,128], index: 1, kind: input, shape index: {}]   ;;  %s3812_s2 = inlined_call_operand.vmem [shape: f32[1,128], index: 2, kind: input, shape index: {}]   ;;  %s3813_s3 = inlined_call_operand.hbm [shape: bf16[128,256], index: 3, kind: input, shape index: {}]   ;;  %s3814_s4 = inlined_call_operand.vmem [shape: f32[1,256], index: 4, kind: input, shape index: {}]   ;;  %s3815_s5 = inlined_call_operand.hbm [shape: bf16[256,256], index: 5, kind: input, shape index: {}]   ;;  %s3816_s6 = inlined_call_operand.vmem [shape: f32[1,256], index: 6, kind: input, shape index: {}]   ;;  %s3817_s7 = inlined_call_operand.hbm [shape: bf16[256,128], index: 7, kind: input, shape index: {}]   ;;  %s3818_s8 = inlined_call_operand.vmem [shape: f32[1,128], index: 8, kind: input, shape index: {}]   ;;  %s3819_s9 = inlined_call_operand.hbm [shape: f32[512,128], index: 9, kind: output, shape index: {}]  }
   0x1   :  { %3826 = sst [smem:[#allocation17_spill]] %s3819_s9 }
   0x2   :  { %14 = vsyncpa [#allocation3], 0 }
   0x3   :  { %16 = vsyncpa [#allocation3 + $0x1], 0 }
   0x4   :  { %17 = vsyncpa [#allocation6], 0 }
   0x5   :  { %18 = vsyncpa [#allocation9], 0 }
   0x6   :  { %19 = vsyncpa [#allocation4], 0 }
   0x7   :  { %21 = vsyncpa [#allocation4 + $0x1], 0  ;;  %s2916_s30 = smov 0   ;;  %s2918_s10 = smov 0  }
   0x8   :  { %s2920_s11 = smov 0   ;;  %s2922_s12 = smov 0  }
   0x9 LB: > { %3827 = sst [smem:[#allocation15_spill]] %s2840_s30  ;;  %s2937_s13 = sadd.s32 4294967295, %s2852_s12   ;;  %s2852_s12 = sphi %s2922_s12, %s3851_s12   ;;  %s2848_s11 = sphi %s2920_s11, %s3850_s11   ;;  %s2844_s10 = sphi %s2918_s10, %s3849_s10   ;;  %s2840_s30 = sphi %s2916_s30, %s3848_s30  }
   0xa   : > { %s2211_s14 = sadd.s32 4294967294, %s2852_s12   ;;  %p47_p0 = scmp.ne.s32.totalorder %s2844_s10, %s2840_s30 }
   0xb   : > { %p3820_p1 = scmp.eq.s32.totalorder %s2937_s13, 0  ;;  %p245_p3 = scmp.eq.s32.totalorder %s2211_s14, 1 }
   0xc   : > { %p2212_p5 = scmp.ge.s32.totalorder %s2852_s12, 1  ;;  %p252_p7 = scmp.lt.s32.totalorder %s2852_s12, 3 }
   0xd   : > { %p2946_p4 = por %p3820_p1, %p47_p0  ;;  %p2951_p6 = por %p245_p3, %p47_p0 }
   0xe   : > { %p2956_p8 = pnand %p2212_p5, %p252_p7  ;;  %s2854_s18 = smov [#allocation5]  }
   0xf   : > { %s3828_s15 = scalar_select %p2946_p4, 1, 0 }
  0x10   : > { %s3829_s16 = scalar_select %p2951_p6, 1, 0 }
  0x11   : > { %s3831_s17 = scalar_select %p2956_p8, 1, 0 }
  0x12   : > { %3830 = sst [smem:[#allocation16_spill]] %s3829_s16  ;;  %s270_s19 = sshll.u32 %s2854_s18, 4  ;;  %s2960_s19 = int_to_ptr.vmem [resolvable:$true] %s270_s19 }
  0x13   : > { %p2444_p9 = pneg %p2956_p8  ;;  %s2855_s21 = smov [#allocation7]  }
  0x14   : > { %s286_s22 = sshll.u32 %s2855_s21, 4  ;;  %s2856_s23 = smov [#allocation8]   ;;  %s2971_s22 = int_to_ptr.vmem [resolvable:$true] %s286_s22 }
  0x15   : > { %p2967_p11 = pnand %p2444_p9, %p3820_p1  ;;  %s2973_s24 = sshll.u32 %s2856_s23, 4  ;;  %s303_s24 = int_to_ptr.vmem [resolvable:$true] %s2973_s24 }
  0x16   : > { %s2664_s27 = scalar_lea.hbm %s3813_s3, 2048 }
  0x17   : > { %p2665_p12 = scmp.ne.s32.totalorder %s3813_s3, %s2664_s27  ;;  %p2983_p13 = pneg %p2967_p11 }
  0x18   : > { %p2671_p5 = scmp.lt.u32.totalorder %s2664_s27, %s3813_s3 }
  0x19   : > { %p2667_p0 = pnand %p2983_p13, %p2665_p12 }
  0x1b   : > { %p2668_p3 = pneg %p2667_p0 }
  0x1d   : > { %p2673_p7 = pnand %p2671_p5, %p2668_p3 }
  0x1f   : > { %2676 = shalt.err (!%p2673_p7)
}
  0x20   : > { %s2677_s23 = scalar_lea.vmem %s2960_s19, 2048  ;;  %p2685_p2 = scmp.lt.s32.totalorder %s2960_s19, %s2960_s19 }
  0x21   : > { %p2678_p9 = scmp.ne.s32.totalorder %s2960_s19, %s2677_s23  ;;  %p2686_p6 = scmp.lt.s32.totalorder %s2677_s23, %s2677_s23 }
  0x23   : > { %p2680_p10 = pnand %p2678_p9, %p2983_p13  ;;  %p2687_p12 = por %p2686_p6, %p2685_p2 }
  0x25   : > { %p2681_p1 = pneg %p2680_p10 }
  0x27   : > { %p2688_p0 = pnand %p2687_p12, %p2681_p1 }
  0x29   : > { %2691 = shalt.err (!%p2688_p0)
}
  0x2a   : > { %s2857_s25 = smov 128   ;;  %s2858_s26 = smov 8  }
  0x2b   : > { %2447 = dma.hbm_to_vmem [thread:$0]  (!%p2967_p11), %s3813_s3, 2048, %s2960_s19, [#allocation6], %s2857_s25, %s2857_s25, %s2858_s26  }
  0x2c   : > { %s2692_s21 = scalar_lea.hbm %s3815_s5, 4096 }
  0x2d   : > { %p2693_p1 = scmp.ne.s32.totalorder %s3815_s5, %s2692_s21  ;;  %p2699_p10 = scmp.lt.u32.totalorder %s2692_s21, %s3815_s5 }
  0x2f   : > { %p2695_p2 = pnand %p2693_p1, %p2983_p13 }
  0x31   : > { %p2696_p6 = pneg %p2695_p2 }
  0x33   : > { %p2701_p3 = pnand %p2699_p10, %p2696_p6 }
  0x35   : > { %2704 = shalt.err (!%p2701_p3)
}
  0x36   : > { %s2705_s19 = scalar_lea.vmem %s2971_s22, 4096  ;;  %p2713_p12 = scmp.lt.s32.totalorder %s2971_s22, %s2971_s22 }
  0x37   : > { %p2706_p5 = scmp.ne.s32.totalorder %s2971_s22, %s2705_s19  ;;  %p2714_p0 = scmp.lt.s32.totalorder %s2705_s19, %s2705_s19 }
  0x39   : > { %p2708_p7 = pnand %p2706_p5, %p2983_p13  ;;  %p2715_p1 = por %p2714_p0, %p2713_p12 }
  0x3b   : > { %p2709_p9 = pneg %p2708_p7 }
  0x3d   : > { %p2716_p2 = pnand %p2715_p1, %p2709_p9 }
  0x3f   : > { %2719 = shalt.err (!%p2716_p2)
}
  0x40   : > { %2450 = dma.hbm_to_vmem [thread:$0]  (!%p2967_p11), %s3815_s5, 4096, %s2971_s22, [#allocation6], %s2857_s25, %s2857_s25, %s2858_s26  }
  0x41   : > { %s2720_s28 = scalar_lea.hbm %s3817_s7, 2048 }
  0x42   : > { %p2721_p6 = scmp.ne.s32.totalorder %s3817_s7, %s2720_s28  ;;  %p2727_p5 = scmp.lt.u32.totalorder %s2720_s28, %s3817_s7 }
  0x44   : > { %p2723_p10 = pnand %p2721_p6, %p2983_p13 }
  0x46   : > { %p2724_p3 = pneg %p2723_p10 }
  0x48   : > { %p2729_p7 = pnand %p2727_p5, %p2724_p3 }
  0x4a   : > { %2732 = shalt.err (!%p2729_p7)
}
  0x4b   : > { %s2733_s19 = scalar_lea.vmem %s303_s24, 2048  ;;  %p2741_p1 = scmp.lt.s32.totalorder %s303_s24, %s303_s24 }
  0x4c   : > { %p2734_p9 = scmp.ne.s32.totalorder %s303_s24, %s2733_s19  ;;  %p2742_p2 = scmp.lt.s32.totalorder %s2733_s19, %s2733_s19 }
  0x4e   : > { %p2736_p12 = pnand %p2734_p9, %p2983_p13  ;;  %p2743_p4 = por %p2742_p2, %p2741_p1 }
  0x50   : > { %p2737_p0 = pneg %p2736_p12 }
  0x52   : > { %p2744_p8 = pnand %p2743_p4, %p2737_p0 }
  0x54   : > { %2747 = shalt.err (!%p2744_p8)
}
  0x55   : > { %s2859_s22 = smov 64   ;;  %s2860_s14 = smov 4  }
  0x56   : > { %2453 = dma.hbm_to_vmem [thread:$0]  (!%p2967_p11), %s3817_s7, 2048, %s303_s24, [#allocation9], %s2859_s22, %s2859_s22, %s2860_s14  }
  0x57   : > { %s3053_s16 = sadd.s32 1, %s2852_s12   ;;  %s34_s28 = sadd.s32 1, %s2848_s11 }
  0x58   : > { %s31_s27 = ssub.s32 %s2852_s12, %s3053_s16  ;;  %p41_p8 = scmp.ne.s32.totalorder %s2848_s11, %s2844_s10 }
  0x59   : > { %p32_p4 = scmp.eq.s32.totalorder %s31_s27, 0  ;;  %p42_p13 = scmp.eq.s32.totalorder %s2852_s12, 0 }
  0x5a   : > { %p2465_p6 = scmp.lt.s32.totalorder %s2852_s12, 2  ;;  %p3834_p3 = scmp.eq.s32.totalorder %s2937_s13, 1 }
  0x5b   : > { %s3063_s29 = scalar_select %p32_p4, %s2848_s11, %s34_s28  }
  0x5c   : > { %p43_p10 = por %p42_p13, %p41_p8  ;;  %p3067_p5 = por %p3834_p3, %p41_p8 }
  0x5d   : > { %s319_s20 = sand.u32 1, %s2848_s11   ;;  %s2298_s21 = sshll.u32 %s2852_s12, 12 }
  0x5e   : > { %s2217_s24 = sshll.u32 %s319_s20, 8  ;;  %s3076_s22 = scalar_lea.hbm %s3810_s0, %s2298_s21 }
  0x5f   : > { %s323_s14 = scalar_lea.vmem [#allocation2], %s2217_s24  ;;  %p3078_p11 = pnand %p2465_p6, %p43_p10 }
  0x60   : > { %s330_s9 = sshll.u32 %s323_s14, 4  ;;  %s3084_s27 = scalar_lea.sflag [#allocation3], %s319_s20  ;;  %s3082_s9 = int_to_ptr.vmem [resolvable:$true] %s330_s9 }
  0x61   : > { %s2748_s28 = scalar_lea.hbm %s3076_s22, 4096  ;;  %p2750_p9 = pneg %p3078_p11 }
  0x62   : > { %p2749_p7 = scmp.ne.s32.totalorder %s3076_s22, %s2748_s28  ;;  %s2753_s23 = scalar_lea.hbm %s3810_s0, 8192 }
  0x63   : > { %p2754_p1 = scmp.lt.u32.totalorder %s3076_s22, %s3810_s0  ;;  %p2755_p2 = scmp.lt.u32.totalorder %s2753_s23, %s2748_s28 }
  0x64   : > { %p2751_p12 = pnand %p2750_p9, %p2749_p7  ;;  %p2757_p8 = scmp.lt.u32.totalorder %s2748_s28, %s3076_s22 }
  0x65   : > { %p2756_p4 = por %p2755_p2, %p2754_p1 }
  0x66   : > { %p2752_p0 = pneg %p2751_p12 }
  0x67   : > { %p2758_p13 = por %p2757_p8, %p2756_p4 }
  0x69   : > { %p2759_p6 = pnand %p2758_p13, %p2752_p0 }
  0x6b   : > { %2762 = shalt.err (!%p2759_p6)
}
  0x6c   : > { %s2763_s20 = scalar_lea.vmem %s3082_s9, 4096  ;;  %s2861_s21 = smov [#allocation2]  }
  0x6d   : > { %p2764_p10 = scmp.ne.s32.totalorder %s3082_s9, %s2763_s20  ;;  %s2768_s24 = sshll.u32 %s2861_s21, 4  ;;  %s2769_s24 = int_to_ptr.vmem [resolvable:$false] %s2768_s24 }
  0x6e   : > { %s2770_s19 = scalar_lea.vmem %s2769_s24, 8192  ;;  %p2771_p12 = scmp.lt.s32.totalorder %s3082_s9, %s2769_s24 }
  0x6f   : > { %p2766_p3 = pnand %p2764_p10, %p2750_p9  ;;  %p2772_p1 = scmp.lt.s32.totalorder %s2770_s19, %s2763_s20 }
  0x71   : > { %p2767_p7 = pneg %p2766_p3  ;;  %p2773_p2 = por %p2772_p1, %p2771_p12 }
  0x73   : > { %p2774_p4 = pnand %p2773_p2, %p2767_p7 }
  0x75   : > { %2777 = shalt.err (!%p2774_p4)
}
  0x76   : > { %2457 = dma.hbm_to_vmem [thread:$0]  (!%p3078_p11), %s3076_s22, 4096, %s3082_s9, %s3084_s27, %s2857_s25, %s2857_s25, %s2858_s26  }
  0x77   : > { %p3837_p9 = scmp.ne.s32.totalorder %s3831_s17, 0 }
  0x78   : > { %s3118_s28 = sand.u32 (!%p3837_p9), 1, %s2844_s10   ;;  %p3838_p0 = scmp.ne.s32.totalorder (!%p3837_p9), %s3828_s15, 0 }
  0x79   : > { %342 = sbr.rel (%p3837_p9) target bundleno = 1324 (0x52c), region = 56  ;;  %s2221_s23 = sshll.u32 (!%p3837_p9), %s3118_s28, 8 }
  0x7a   : > { %s345_s14 = scalar_lea.sflag (!%p3837_p9), [#allocation3], %s3118_s28  ;;  %s3124_s30 = scalar_lea.vmem (!%p3837_p9), [#allocation2], %s2221_s23 }
  0x80   : > { %2823 = dma.done.wait (%p3838_p0), %s345_s14, 4096  }
  0x81   : > { %2825 = vsyncadd (%p3838_p0), %s345_s14, 4294963200  ;;  %p3839_p11 = scmp.eq.s32.totalorder %s2937_s13, 0 }
  0x83   : > { %2827 = dma.done.wait (%p3839_p11), [#allocation6], 6144   ;;  %p3840_p8 = pmov %p3839_p11 }
  0x85   : > { %2829 = vsyncadd (%p3840_p8), [#allocation6], 4294961152  ;;  %p3841_p13 = pmov %p3840_p8 }
  0x86   : > { %p3842_p6 = pmov %p3840_p8 }
  0x87   : > { %2831 = dma.done.wait (%p3841_p13), [#allocation9], 2048  }
  0x88   : > { %2833 = vsyncadd (%p3842_p6), [#allocation9], 4294965248  ;;  %v398_v0 = vld [vmem:[%s3124_s30] sm:$0xff]  ;;  %v400_v1 = vld [vmem:[%s3124_s30 + $0x10] sm:$0xff]  ;;  %s3694_s19 = scalar_lea.vmem [#allocation10], %s2221_s23  ;;  %s2299_s23 = sshll.u32 %s2937_s13, 12 }
  0x89   : > { %430 = vadd.xlane.f32.xlu0 %v398_v0  ;;  %434 = vadd.xlane.f32.xlu1 %v400_v1  ;;  %v399_v2 = vld [vmem:[%s3124_s30 + $0x8] sm:$0xff]  ;;  %v401_v3 = vld [vmem:[%s3124_s30 + $0x18] sm:$0xff]  ;;  %v3143_v4 = vld [vmem:[%s3124_s30 + $0x20] sm:$0xff]  ;;  %s2109_s14 = sshll.u32 %s3694_s19, 4  ;;  %s3843_s17 = sld [smem:[#allocation17_spill]]  ;;  %s3763_s14 = int_to_ptr.vmem [resolvable:$true] %s2109_s14 }
  0x8a   : > { %v3146_v5 = vld [vmem:[%s3124_s30 + $0x28] sm:$0xff]  ;;  %v3149_v6 = vld [vmem:[%s3124_s30 + $0x30] sm:$0xff]  ;;  %v3152_v7 = vld [vmem:[%s3124_s30 + $0x38] sm:$0xff]  ;;  %s2096_s13 = scalar_lea.sflag [#allocation4], %s3118_s28  ;;  %s2778_s26 = scalar_lea.vmem %s3763_s14, 4096 }
  0x8b   : > { %v3157_v8 = vld [vmem:[%s3124_s30 + $0x40] sm:$0xff]  ;;  %v3160_v9 = vld [vmem:[%s3124_s30 + $0x48] sm:$0xff]  ;;  %v3165_v10 = vld [vmem:[%s3124_s30 + $0x50] sm:$0xff]  ;;  %p2779_p10 = scmp.ne.s32.totalorder %s3763_s14, %s2778_s26  ;;  %s2863_s22 = smov [#allocation10]  }
  0x8c   : > { %v3168_v11 = vld [vmem:[%s3124_s30 + $0x58] sm:$0xff]  ;;  %v3173_v12 = vld [vmem:[%s3124_s30 + $0x60] sm:$0xff]  ;;  %v3178_v13 = vld [vmem:[%s3124_s30 + $0x68] sm:$0xff]  ;;  %s2782_s9 = sshll.u32 %s2863_s22, 4  ;;  %s2783_s9 = int_to_ptr.vmem [resolvable:$false] %s2782_s9 }
  0x8d   : > { %432 = vadd.xlane.f32.xlu0 %v399_v2  ;;  %436 = vadd.xlane.f32.xlu1 %v401_v3  ;;  %v3181_v14 = vld [vmem:[%s3124_s30 + $0x70] sm:$0xff]  ;;  %v3184_v15 = vld [vmem:[%s3124_s30 + $0x78] sm:$0xff]  ;;  %v3189_v16 = vld [vmem:[%s3124_s30 + $0x80] sm:$0xff]  ;;  %p2780_p3 = pnand %p2779_p10, %p3067_p5  ;;  %s2784_s27 = scalar_lea.vmem %s2783_s9, 8192 }
  0x8e   : > { %v3194_v17 = vld [vmem:[%s3124_s30 + $0x88] sm:$0xff]  ;;  %v3199_v18 = vld [vmem:[%s3124_s30 + $0x90] sm:$0xff]  ;;  %v3202_v19 = vld [vmem:[%s3124_s30 + $0x98] sm:$0xff]  ;;  %p2785_p12 = scmp.lt.s32.totalorder %s3763_s14, %s2783_s9  ;;  %p2786_p1 = scmp.lt.s32.totalorder %s2784_s27, %s2778_s26 }
  0x8f   : > { %v2512_v20 = vld [vmem:[#allocation5 + $0x4] ss:$8 sps:$4 sm:$0xff]   ;;  %v2514_v21 = vld [vmem:[#allocation5] ss:$8 sps:$4 sm:$0xff]   ;;  %v2515_v22 = vld [vmem:[#allocation5 + $0x14] ss:$8 sps:$4 sm:$0xff]   ;;  %s3761_s25 = scalar_lea.hbm %s3843_s17, %s2299_s23  ;;  %p2781_p7 = pneg %p2780_p3 }
  0x90   : > { %985 = vmatprep.subr.bf16.mxu0 %v2512_v20  ;;  %2412 = vmatprep.subr.bf16.mxu1 %v2512_v20  ;;  %v3215_v35 = vld [vmem:[%s3124_s30 + $0xa0] sm:$0xff]  ;;  %v3225_v41 = vld [vmem:[%s3124_s30 + $0xa8] sm:$0xff]  ;;  %v3234_v46 = vld [vmem:[%s3124_s30 + $0xb0] sm:$0xff]  ;;  %p2787_p2 = por %p2786_p1, %p2785_p12 }
  0x91   : > { %438 = vadd.xlane.f32.xlu0 %v3143_v4  ;;  %440 = vadd.xlane.f32.xlu1 %v3146_v5  ;;  %v2517_v51 = vld [vmem:[#allocation5 + $0x10] ss:$8 sps:$4 sm:$0xff]   ;;  %v2518_v54 = vld [vmem:[#allocation5 + $0x24] ss:$8 sps:$4 sm:$0xff]   ;;  %v2520_v58 = vld [vmem:[#allocation5 + $0x20] ss:$8 sps:$4 sm:$0xff]  }
  0x92   : > { %986 = vmatpush1.bf16.msra.mxu0 %v2514_v21  ;;  %2420 = vmatpush1.bf16.msra.mxu1 %v2514_v21  ;;  %v3243_v52 = vld [vmem:[%s3124_s30 + $0xb8] sm:$0xff]  ;;  %v3252_v59 = vld [vmem:[%s3124_s30 + $0xc0] sm:$0xff]  ;;  %p2788_p4 = pnand %p2787_p2, %p2781_p7 }
  0x93   : > { %987 = vmatprep.subr.bf16.mxu0 %v2515_v22  ;;  %2413 = vmatprep.subr.bf16.mxu1 %v2515_v22  ;;  %v2521_v61 = vld [vmem:[#allocation5 + $0x34] ss:$8 sps:$4 sm:$0xff]   ;;  %v2526_v21 = vld [vmem:[#allocation5 + $0x40] ss:$8 sps:$4 sm:$0xff]  }
  0x94   : > { %v3270_v22 = vld [vmem:[%s3124_s30 + $0xd0] sm:$0xff] }
  0x95   : > { %442 = vadd.xlane.f32.xlu0 %v3149_v6  ;;  %444 = vadd.xlane.f32.xlu1 %v3152_v7 }
  0x96   : > { %988 = vmatpush1.bf16.msra.mxu0 %v2517_v51  ;;  %2421 = vmatpush1.bf16.msra.mxu1 %v2517_v51 }
  0x97   : > { %989 = vmatprep.subr.bf16.mxu0 %v2518_v54  ;;  %2414 = vmatprep.subr.bf16.mxu1 %v2518_v54 }
  0x99   : > { %446 = vadd.xlane.f32.xlu0 %v3157_v8  ;;  %448 = vadd.xlane.f32.xlu1 %v3160_v9 }
  0x9a   : > { %990 = vmatpush1.bf16.msra.mxu0 %v2520_v58  ;;  %2422 = vmatpush1.bf16.msra.mxu1 %v2520_v58  ;;  %v3306_v58 = vld [vmem:[%s3124_s30 + $0xf0] sm:$0xff] }
  0x9b   : > { %991 = vmatprep.subr.bf16.mxu0 %v2521_v61  ;;  %2415 = vmatprep.subr.bf16.mxu1 %v2521_v61 }
  0x9d   : > { %450 = vadd.xlane.f32.xlu0 %v3165_v10  ;;  %452 = vadd.xlane.f32.xlu1 %v3168_v11 }
  0xa1   : > { %454 = vadd.xlane.f32.xlu0 %v3173_v12  ;;  %456 = vadd.xlane.f32.xlu1 %v3178_v13 }
  0xa5   : > { %458 = vadd.xlane.f32.xlu0 %v3181_v14  ;;  %460 = vadd.xlane.f32.xlu1 %v3184_v15 }
  0xa9   : > { %462 = vadd.xlane.f32.xlu0 %v3189_v16  ;;  %464 = vadd.xlane.f32.xlu1 %v3194_v17 }
  0xad   : > { %466 = vadd.xlane.f32.xlu0 %v3199_v18  ;;  %468 = vadd.xlane.f32.xlu1 %v3202_v19 }
 0x116   : > { %v431_v23 = vpop.xlane.xlu0 %430  ;;  %v435_v24 = vpop.xlane.xlu1 %434 }
 0x117   : > { %v495_v25 = vmul.f32 0.0078125, %v431_v23  ;;  %v497_v27 = vmul.f32 0.0078125, %v435_v24 }
 0x119   : > { %v3206_v26 = vsub.f32 %v398_v0, %v495_v25  ;;  %v3212_v33 = vsub.f32 %v400_v1, %v497_v27  ;;  %v2523_v1 = vld [vmem:[#allocation5 + $0x30] ss:$8 sps:$4 sm:$0xff]   ;;  %v2527_v25 = vld [vmem:[#allocation5 + $0x54] ss:$8 sps:$4 sm:$0xff]  }
 0x11a   : > { %v433_v28 = vpop.xlane.xlu0 %432  ;;  %v437_v29 = vpop.xlane.xlu1 %436  ;;  %992 = vmatpush1.bf16.msra.mxu0 %v2523_v1  ;;  %2423 = vmatpush1.bf16.msra.mxu1 %v2523_v1 }
 0x11b   : > { %v496_v30 = vmul.f32 0.0078125, %v433_v28  ;;  %v559_v31 = vmul.f32 %v3206_v26, %v3206_v26  ;;  %v498_v34 = vmul.f32 0.0078125, %v437_v29  ;;  %v561_v39 = vmul.f32 %v3212_v33, %v3212_v33  ;;  %v2529_v29 = vld [vmem:[#allocation5 + $0x50] ss:$8 sps:$4 sm:$0xff]  }
 0x11d   : > { %v3210_v32 = vsub.f32 %v399_v2, %v496_v30  ;;  %591 = vadd.xlane.f32.xlu0 %v559_v31  ;;  %v3220_v38 = vsub.f32 %v401_v3, %v498_v34  ;;  %v3261_v2 = vld [vmem:[%s3124_s30 + $0xc8] sm:$0xff]  ;;  %v3279_v30 = vld [vmem:[%s3124_s30 + $0xd8] sm:$0xff] }
 0x11e   : > { %v439_v36 = vpop.xlane.xlu0 %438  ;;  %v441_v42 = vpop.xlane.xlu1 %440  ;;  %v2530_v34 = vld [vmem:[#allocation5 + $0x64] ss:$8 sps:$4 sm:$0xff]  }
 0x11f   : > { %v560_v37 = vmul.f32 %v3210_v32, %v3210_v32  ;;  %v499_v40 = vmul.f32 0.0078125, %v439_v36  ;;  %v562_v44 = vmul.f32 %v3220_v38, %v3220_v38  ;;  %v500_v45 = vmul.f32 0.0078125, %v441_v42 }
 0x121   : > { %470 = vadd.xlane.f32.xlu0 %v3215_v35  ;;  %593 = vadd.xlane.f32.xlu1 %v560_v37  ;;  %v3229_v43 = vsub.f32 %v3143_v4, %v499_v40  ;;  %v3238_v48 = vsub.f32 %v3146_v5, %v500_v45  ;;  %v2524_v5 = vld [vmem:[#allocation5 + $0x44] ss:$8 sps:$4 sm:$0xff]  }
 0x122   : > { %v443_v47 = vpop.xlane.xlu0 %442  ;;  %v445_v53 = vpop.xlane.xlu1 %444  ;;  %993 = vmatprep.subr.bf16.mxu0 %v2524_v5  ;;  %2416 = vmatprep.subr.bf16.mxu1 %v2524_v5  ;;  %v3288_v40 = vld [vmem:[%s3124_s30 + $0xe0] sm:$0xff] }
 0x123   : > { %v563_v49 = vmul.f32 %v3229_v43, %v3229_v43  ;;  %v501_v50 = vmul.f32 0.0078125, %v443_v47  ;;  %v564_v56 = vmul.f32 %v3238_v48, %v3238_v48  ;;  %v502_v57 = vmul.f32 0.0078125, %v445_v53  ;;  %994 = vmatpush1.bf16.msra.mxu0 %v2526_v21  ;;  %2424 = vmatpush1.bf16.msra.mxu1 %v2526_v21 }
 0x124   : > { %995 = vmatprep.subr.bf16.mxu0 %v2527_v25  ;;  %2417 = vmatprep.subr.bf16.mxu1 %v2527_v25 }
 0x125   : > { %595 = vadd.xlane.f32.xlu0 %v561_v39  ;;  %472 = vadd.xlane.f32.xlu1 %v3225_v41  ;;  %v3247_v55 = vsub.f32 %v3149_v6, %v501_v50  ;;  %v3256_v62 = vsub.f32 %v3152_v7, %v502_v57  ;;  %v2532_v39 = vld [vmem:[#allocation5 + $0x60] ss:$8 sps:$4 sm:$0xff]  }
 0x126   : > { %v447_v60 = vpop.xlane.xlu0 %446  ;;  %v449_v3 = vpop.xlane.xlu1 %448  ;;  %v3297_v50 = vld [vmem:[%s3124_s30 + $0xe8] sm:$0xff] }
 0x127   : > { %v565_v63 = vmul.f32 %v3247_v55, %v3247_v55  ;;  %v503_v0 = vmul.f32 0.0078125, %v447_v60  ;;  %v566_v7 = vmul.f32 %v3256_v62, %v3256_v62  ;;  %v504_v20 = vmul.f32 0.0078125, %v449_v3  ;;  %996 = vmatpush1.bf16.msra.mxu0 %v2529_v29  ;;  %2425 = vmatpush1.bf16.msra.mxu1 %v2529_v29 }
 0x128   : > { %997 = vmatprep.subr.bf16.mxu0 %v2530_v34  ;;  %2418 = vmatprep.subr.bf16.mxu1 %v2530_v34  ;;  %v2862_v60 = vmov 0  }
 0x129   : > { %474 = vadd.xlane.f32.xlu0 %v3234_v46  ;;  %597 = vadd.xlane.f32.xlu1 %v562_v44  ;;  %v3265_v6 = vsub.f32 %v3157_v8, %v503_v0  ;;  %v3274_v8 = vsub.f32 %v3160_v9, %v504_v20  ;;  %v2533_v44 = vld [vmem:[#allocation5 + $0x74] ss:$8 sps:$4 sm:$0xff]  }
 0x12a   : > { %v451_v4 = vpop.xlane.xlu0 %450  ;;  %v453_v23 = vpop.xlane.xlu1 %452  ;;  %1017 = vmatprep.mubr.bf16.mxu0 %v2862_v60  ;;  %1097 = vmatprep.mubr.bf16.mxu1 %v2862_v60 }
 0x12b   : > { %v567_v27 = vmul.f32 %v3265_v6, %v3265_v6  ;;  %v505_v28 = vmul.f32 0.0078125, %v451_v4  ;;  %v568_v36 = vmul.f32 %v3274_v8, %v3274_v8  ;;  %v506_v37 = vmul.f32 0.0078125, %v453_v23  ;;  %998 = vmatpush1.bf16.msra.mxu0 %v2532_v39  ;;  %2426 = vmatpush1.bf16.msra.mxu1 %v2532_v39  ;;  %v3320_v4 = vld [vmem:[%s3124_s30 + $0xf8] sm:$0xff] }
 0x12c   : > { %999 = vmatprep.subr.bf16.mxu0 %v2533_v44  ;;  %2419 = vmatprep.subr.bf16.mxu1 %v2533_v44 }
 0x12d   : > { %476 = vadd.xlane.f32.xlu1 %v3243_v52  ;;  %599 = vadd.xlane.f32.xlu0 %v563_v49  ;;  %v3283_v9 = vsub.f32 %v3165_v10, %v505_v28  ;;  %v3292_v10 = vsub.f32 %v3168_v11, %v506_v37  ;;  %v2535_v49 = vld [vmem:[#allocation5 + $0x70] ss:$8 sps:$4 sm:$0xff]  }
 0x12e   : > { %v455_v24 = vpop.xlane.xlu0 %454  ;;  %v457_v31 = vpop.xlane.xlu1 %456 }
 0x12f   : > { %v569_v45 = vmul.f32 %v3283_v9, %v3283_v9  ;;  %v507_v47 = vmul.f32 0.0078125, %v455_v24  ;;  %1000 = vmatpush1.bf16.msra.mxu0 %v2535_v49  ;;  %2427 = vmatpush1.bf16.msra.mxu1 %v2535_v49  ;;  %v508_v53 = vmul.f32 0.0078125, %v457_v31 }
 0x131   : > { %601 = vadd.xlane.f32.xlu1 %v564_v56  ;;  %478 = vadd.xlane.f32.xlu0 %v3252_v59  ;;  %v3301_v11 = vsub.f32 %v3173_v12, %v507_v47  ;;  %v570_v56 = vmul.f32 %v3292_v10, %v3292_v10  ;;  %v3311_v61 = vsub.f32 %v3178_v13, %v508_v53 }
 0x132   : > { %v459_v42 = vpop.xlane.xlu0 %458  ;;  %v461_v51 = vpop.xlane.xlu1 %460 }
 0x133   : > { %v509_v57 = vmul.f32 0.0078125, %v459_v42  ;;  %v571_v1 = vmul.f32 %v3301_v11, %v3301_v11  ;;  %v572_v13 = vmul.f32 %v3311_v61, %v3311_v61 }
 0x135   : > { %480 = vadd.xlane.f32.xlu1 %v3261_v2  ;;  %603 = vadd.xlane.f32.xlu0 %v565_v63  ;;  %v510_v63 = vmul.f32 0.0078125, %v461_v51  ;;  %v3315_v12 = vsub.f32 %v3181_v14, %v509_v57 }
 0x136   : > { %v463_v54 = vpop.xlane.xlu0 %462  ;;  %v465_v0 = vpop.xlane.xlu1 %464 }
 0x137   : > { %v511_v3 = vmul.f32 0.0078125, %v463_v54  ;;  %v573_v14 = vmul.f32 %v3315_v12, %v3315_v12  ;;  %v512_v21 = vmul.f32 0.0078125, %v465_v0 }
 0x139   : > { %605 = vadd.xlane.f32.xlu1 %v566_v7  ;;  %482 = vadd.xlane.f32.xlu0 %v3270_v22  ;;  %v3323_v7 = vsub.f32 %v3184_v15, %v510_v63  ;;  %v3329_v20 = vsub.f32 %v3189_v16, %v511_v3  ;;  %v3336_v15 = vsub.f32 %v3194_v17, %v512_v21 }
 0x13a   : > { %v467_v5 = vpop.xlane.xlu0 %466  ;;  %v469_v24 = vpop.xlane.xlu1 %468 }
 0x13b   : > { %v513_v23 = vmul.f32 0.0078125, %v467_v5  ;;  %v574_v25 = vmul.f32 %v3323_v7, %v3323_v7  ;;  %v575_v16 = vmul.f32 %v3329_v20, %v3329_v20  ;;  %v514_v28 = vmul.f32 0.0078125, %v469_v24 }
 0x13c   : > { %v576_v31 = vmul.f32 %v3336_v15, %v3336_v15 }
 0x13d   : > { %484 = vadd.xlane.f32.xlu1 %v3279_v30  ;;  %607 = vadd.xlane.f32.xlu0 %v567_v27  ;;  %v3339_v27 = vsub.f32 %v3199_v18, %v513_v23  ;;  %v3344_v29 = vsub.f32 %v3202_v19, %v514_v28 }
 0x13f   : > { %v577_v34 = vmul.f32 %v3339_v27, %v3339_v27  ;;  %v578_v17 = vmul.f32 %v3344_v29, %v3344_v29 }
 0x141   : > { %609 = vadd.xlane.f32.xlu1 %v568_v36  ;;  %486 = vadd.xlane.f32.xlu0 %v3288_v40 }
 0x145   : > { %488 = vadd.xlane.f32.xlu1 %v3297_v50  ;;  %611 = vadd.xlane.f32.xlu0 %v569_v45 }
 0x149   : > { %613 = vadd.xlane.f32.xlu1 %v570_v56  ;;  %490 = vadd.xlane.f32.xlu0 %v3306_v58 }
 0x14d   : > { %492 = vadd.xlane.f32.xlu1 %v3320_v4  ;;  %615 = vadd.xlane.f32.xlu0 %v571_v1 }
 0x151   : > { %617 = vadd.xlane.f32.xlu1 %v572_v13  ;;  %619 = vadd.xlane.f32.xlu0 %v573_v14 }
 0x155   : > { %621 = vadd.xlane.f32.xlu1 %v574_v25  ;;  %623 = vadd.xlane.f32.xlu0 %v575_v16 }
 0x159   : > { %625 = vadd.xlane.f32.xlu1 %v576_v31  ;;  %627 = vadd.xlane.f32.xlu0 %v577_v34  ;;  %v3371_v31 = vld [vmem:[%s3811_s1] ss:$0 sm:$0xff] }
 0x15d   : > { %629 = vadd.xlane.f32.xlu1 %v578_v17 }
 0x1aa   : > { %v592_v18 = vpop.xlane.xlu0 %591 }
 0x1ab   : > { %v655_v36 = vmul.f32 0.0078125, %v592_v18 }
 0x1ad   : > { %v687_v37 = vadd.f32 1e-05, %v655_v36 }
 0x1ae   : > { %v594_v39 = vpop.xlane.xlu1 %593  ;;  %v471_v42 = vpop.xlane.xlu0 %470 }
 0x1af   : > { %2600 = vrsqrt.f32 %v687_v37  ;;  %v656_v19 = vmul.f32 0.0078125, %v594_v39  ;;  %v515_v44 = vmul.f32 0.0078125, %v471_v42 }
 0x1b1   : > { %v688_v45 = vadd.f32 1e-05, %v656_v19  ;;  %v3353_v47 = vsub.f32 %v3215_v35, %v515_v44  ;;  %v3383_v44 = vld [vmem:[%s3812_s2] ss:$0 sm:$0xff] }
 0x1b2   : > { %v473_v49 = vpop.xlane.xlu1 %472  ;;  %v596_v51 = vpop.xlane.xlu0 %595 }
 0x1b3   : > { %2602 = vrsqrt.f32 %v688_v45  ;;  %v516_v53 = vmul.f32 0.0078125, %v473_v49  ;;  %v657_v54 = vmul.f32 0.0078125, %v596_v51  ;;  %v579_v56 = vmul.f32 %v3353_v47, %v3353_v47 }
 0x1b5   : > { %v3358_v57 = vsub.f32 %v3225_v41, %v516_v53  ;;  %v689_v63 = vadd.f32 1e-05, %v657_v54  ;;  %631 = vadd.xlane.f32.xlu0 %v579_v56 }
 0x1b6   : > { %v598_v0 = vpop.xlane.xlu1 %597  ;;  %v475_v1 = vpop.xlane.xlu0 %474 }
 0x1b7   : > { %2604 = vrsqrt.f32 %v689_v63  ;;  %v658_v3 = vmul.f32 0.0078125, %v598_v0  ;;  %v517_v5 = vmul.f32 0.0078125, %v475_v1  ;;  %v580_v35 = vmul.f32 %v3358_v57, %v3358_v57 }
 0x1b9   : > { %v2601_v13 = vpop.eup %2600  ;;  %v690_v14 = vadd.f32 1e-05, %v658_v3  ;;  %v3363_v21 = vsub.f32 %v3234_v46, %v517_v5  ;;  %633 = vadd.xlane.f32.xlu1 %v580_v35 }
 0x1ba   : > { %v477_v23 = vpop.xlane.xlu1 %476  ;;  %v600_v24 = vpop.xlane.xlu0 %599  ;;  %v751_v41 = vmul.f32 %v2601_v13, %v3206_v26 }
 0x1bb   : > { %2606 = vrsqrt.f32 %v690_v14  ;;  %v518_v25 = vmul.f32 0.0078125, %v477_v23  ;;  %v659_v16 = vmul.f32 0.0078125, %v600_v24  ;;  %v581_v28 = vmul.f32 %v3363_v21, %v3363_v21 }
 0x1bc   : > { %v790_v37 = vmul.f32 %v3371_v31, %v751_v41 }
 0x1bd   : > { %v2603_v34 = vpop.eup %2602  ;;  %v3374_v46 = vsub.f32 %v3243_v52, %v518_v25  ;;  %v691_v17 = vadd.f32 1e-05, %v659_v16  ;;  %635 = vadd.xlane.f32.xlu0 %v581_v28 }
 0x1be   : > { %v602_v18 = vpop.xlane.xlu1 %601  ;;  %v479_v36 = vpop.xlane.xlu0 %478  ;;  %v752_v26 = vmul.f32 %v2603_v34, %v3210_v32  ;;  %v829_v54 = vadd.f32 %v3383_v44, %v790_v37 }
 0x1bf   : > { %2608 = vrsqrt.f32 %v691_v17  ;;  %v660_v39 = vmul.f32 0.0078125, %v602_v18  ;;  %v519_v42 = vmul.f32 0.0078125, %v479_v36  ;;  %v582_v19 = vmul.f32 %v3374_v46, %v3374_v46 }
 0x1c0   : > { %v791_v52 = vmul.f32 %v3371_v31, %v752_v26 }
 0x1c1   : > { %v2605_v45 = vpop.eup %2604  ;;  %v692_v49 = vadd.f32 1e-05, %v660_v39  ;;  %v3387_v51 = vsub.f32 %v3252_v59, %v519_v42  ;;  %637 = vadd.xlane.f32.xlu1 %v582_v19 }
 0x1c2   : > { %v481_v32 = vpop.xlane.xlu1 %480  ;;  %v604_v53 = vpop.xlane.xlu0 %603  ;;  %v830_v56 = vadd.f32 %v3383_v44, %v791_v52  ;;  %v753_v63 = vmul.f32 %v2605_v45, %v3212_v33 }
 0x1c3   : > { %2610 = vrsqrt.f32 %v692_v49  ;;  %v520_v0 = vmul.f32 0.0078125, %v481_v32  ;;  %v661_v1 = vmul.f32 0.0078125, %v604_v53  ;;  %v583_v3 = vmul.f32 %v3387_v51, %v3387_v51 }
 0x1c4   : > { %v861_v5 = vpack.c.bf16 %v830_v56, %v829_v54  ;;  %v792_v33 = vmul.f32 %v3371_v31, %v753_v63 }
 0x1c5   : > { %v2607_v35 = vpop.eup %2606  ;;  %v3395_v59 = vsub.f32 %v3261_v2, %v520_v0  ;;  %v693_v13 = vadd.f32 1e-05, %v661_v1  ;;  %639 = vadd.xlane.f32.xlu0 %v583_v3 }
 0x1c6   : > { %v606_v14 = vpop.xlane.xlu1 %605  ;;  %1018 = vmatmul.mubr.bf16.vlgmr.msra.gmra.mrb[0].mxu0 %v861_v5  ;;  %v483_v23 = vpop.xlane.xlu0 %482  ;;  %v754_v24 = vmul.f32 %v2607_v35, %v3220_v38  ;;  %v831_v36 = vadd.f32 %v3383_v44, %v792_v33 }
 0x1c7   : > { %2612 = vrsqrt.f32 %v693_v13  ;;  %v662_v41 = vmul.f32 0.0078125, %v606_v14  ;;  %v521_v25 = vmul.f32 0.0078125, %v483_v23  ;;  %v584_v16 = vmul.f32 %v3395_v59, %v3395_v59  ;;  %1027 = vmatprep.mubr.bf16.mxu0 %v2862_v60 }
 0x1c8   : > { %v793_v2 = vmul.f32 %v3371_v31, %v754_v24 }
 0x1c9   : > { %v2609_v28 = vpop.eup %2608  ;;  %v694_v34 = vadd.f32 1e-05, %v662_v41  ;;  %v3404_v17 = vsub.f32 %v3270_v22, %v521_v25  ;;  %641 = vadd.xlane.f32.xlu1 %v584_v16 }
 0x1ca   : > { %v485_v18 = vpop.xlane.xlu1 %484  ;;  %v608_v38 = vpop.xlane.xlu0 %607  ;;  %v832_v26 = vadd.f32 %v3383_v44, %v793_v2  ;;  %v755_v37 = vmul.f32 %v2609_v28, %v3229_v43 }
 0x1cb   : > { %2614 = vrsqrt.f32 %v694_v34  ;;  %v522_v39 = vmul.f32 0.0078125, %v485_v18  ;;  %v663_v42 = vmul.f32 0.0078125, %v608_v38  ;;  %v585_v19 = vmul.f32 %v3404_v17, %v3404_v17 }
 0x1cc   : > { %v862_v52 = vpack.c.bf16 %v832_v26, %v831_v36  ;;  %v794_v43 = vmul.f32 %v3371_v31, %v755_v37 }
 0x1cd   : > { %v2611_v45 = vpop.eup %2610  ;;  %v3412_v22 = vsub.f32 %v3279_v30, %v522_v39  ;;  %v695_v49 = vadd.f32 1e-05, %v663_v42  ;;  %643 = vadd.xlane.f32.xlu0 %v585_v19 }
 0x1ce   : > { %v610_v32 = vpop.xlane.xlu1 %609  ;;  %1028 = vmatmul.mubr.bf16.gmra.mrb[4].mxu0 %v862_v52  ;;  %v487_v53 = vpop.xlane.xlu0 %486  ;;  %v756_v54 = vmul.f32 %v2611_v45, %v3238_v48  ;;  %v833_v13 = vadd.f32 %v3383_v44, %v794_v43 }
 0x1cf   : > { %2616 = vrsqrt.f32 %v695_v49  ;;  %v664_v56 = vmul.f32 0.0078125, %v610_v32  ;;  %v523_v63 = vmul.f32 0.0078125, %v487_v53  ;;  %v586_v0 = vmul.f32 %v3412_v22, %v3412_v22  ;;  %1037 = vmatprep.mubr.bf16.mxu0 %v2862_v60 }
 0x1d0   : > { %v795_v30 = vmul.f32 %v3371_v31, %v756_v54 }
 0x1d1   : > { %v2613_v1 = vpop.eup %2612  ;;  %v696_v3 = vadd.f32 1e-05, %v664_v56  ;;  %v3421_v5 = vsub.f32 %v3288_v40, %v523_v63  ;;  %645 = vadd.xlane.f32.xlu1 %v586_v0 }
 0x1d2   : > { %v489_v35 = vpop.xlane.xlu1 %488  ;;  %v612_v48 = vpop.xlane.xlu0 %611  ;;  %v834_v14 = vadd.f32 %v3383_v44, %v795_v30  ;;  %v757_v23 = vmul.f32 %v2613_v1, %v3247_v55 }
 0x1d3   : > { %2618 = vrsqrt.f32 %v696_v3  ;;  %v524_v24 = vmul.f32 0.0078125, %v489_v35  ;;  %v665_v33 = vmul.f32 0.0078125, %v612_v48  ;;  %v587_v41 = vmul.f32 %v3421_v5, %v3421_v5 }
 0x1d4   : > { %v863_v25 = vpack.c.bf16 %v834_v14, %v833_v13  ;;  %v796_v55 = vmul.f32 %v3371_v31, %v757_v23 }
 0x1d5   : > { %v2615_v16 = vpop.eup %2614  ;;  %v3429_v40 = vsub.f32 %v3297_v50, %v524_v24  ;;  %v697_v2 = vadd.f32 1e-05, %v665_v33  ;;  %647 = vadd.xlane.f32.xlu0 %v587_v41 }
 0x1d6   : > { %v614_v28 = vpop.xlane.xlu1 %613  ;;  %1038 = vmatmul.mubr.bf16.gmra.mrb[8].mxu0 %v863_v25  ;;  %v491_v34 = vpop.xlane.xlu0 %490  ;;  %v758_v18 = vmul.f32 %v2615_v16, %v3256_v62  ;;  %v835_v52 = vadd.f32 %v3383_v44, %v796_v55 }
 0x1d7   : > { %2620 = vrsqrt.f32 %v697_v2  ;;  %v666_v38 = vmul.f32 0.0078125, %v614_v28  ;;  %v525_v36 = vmul.f32 0.0078125, %v491_v34  ;;  %v588_v26 = vmul.f32 %v3429_v40, %v3429_v40  ;;  %1047 = vmatprep.mubr.bf16.mxu0 %v2862_v60  ;;  %v2538_v28 = vld [vmem:[#allocation7 + $0x4] ss:$8 sps:$4 sm:$0xff]  }
 0x1d8   : > { %v797_v50 = vmul.f32 %v3371_v31, %v758_v18  ;;  %1478 = vmatprep.subr.bf16.mxu1 %v2538_v28 }
 0x1d9   : > { %v2617_v37 = vpop.eup %2616  ;;  %v698_v39 = vadd.f32 1e-05, %v666_v38  ;;  %v3438_v42 = vsub.f32 %v3306_v58, %v525_v36  ;;  %649 = vadd.xlane.f32.xlu1 %v588_v26 }
 0x1da   : > { %v493_v19 = vpop.xlane.xlu1 %492  ;;  %v616_v62 = vpop.xlane.xlu0 %615  ;;  %v836_v45 = vadd.f32 %v3383_v44, %v797_v50  ;;  %v759_v49 = vmul.f32 %v2617_v37, %v3265_v6 }
 0x1db   : > { %2622 = vrsqrt.f32 %v698_v39  ;;  %v526_v32 = vmul.f32 0.0078125, %v493_v19  ;;  %v667_v53 = vmul.f32 0.0078125, %v616_v62  ;;  %v589_v54 = vmul.f32 %v3438_v42, %v3438_v42 }
 0x1dc   : > { %v864_v43 = vpack.c.bf16 %v836_v45, %v835_v52  ;;  %v798_v6 = vmul.f32 %v3371_v31, %v759_v49 }
 0x1dd   : > { %v2619_v56 = vpop.eup %2618  ;;  %v3446_v58 = vsub.f32 %v3320_v4, %v526_v32  ;;  %v699_v63 = vadd.f32 1e-05, %v667_v53  ;;  %651 = vadd.xlane.f32.xlu0 %v589_v54 }
 0x1de   : > { %v618_v0 = vpop.xlane.xlu1 %617  ;;  %1048 = vmatmul.mubr.bf16.gmra.mrb[12].mxu0 %v864_v43  ;;  %v620_v30 = vpop.xlane.xlu0 %619  ;;  %v760_v1 = vmul.f32 %v2619_v56, %v3274_v8  ;;  %v837_v8 = vadd.f32 %v3383_v44, %v798_v6 }
 0x1df   : > { %2624 = vrsqrt.f32 %v699_v63  ;;  %v668_v3 = vmul.f32 0.0078125, %v618_v0  ;;  %v669_v35 = vmul.f32 0.0078125, %v620_v30  ;;  %v590_v48 = vmul.f32 %v3446_v58, %v3446_v58  ;;  %1057 = vmatprep.mubr.bf16.mxu0 %v2862_v60 }
 0x1e0   : > { %v799_v4 = vmul.f32 %v3371_v31, %v760_v1 }
 0x1e1   : > { %v2621_v13 = vpop.eup %2620  ;;  %v700_v14 = vadd.f32 1e-05, %v668_v3  ;;  %v701_v23 = vadd.f32 1e-05, %v669_v35  ;;  %653 = vadd.xlane.f32.xlu1 %v590_v48 }
 0x1e2   : > { %v622_v24 = vpop.xlane.xlu1 %621  ;;  %v624_v33 = vpop.xlane.xlu0 %623  ;;  %v838_v41 = vadd.f32 %v3383_v44, %v799_v4  ;;  %v761_v25 = vmul.f32 %v2621_v13, %v3283_v9 }
 0x1e3   : > { %2626 = vrsqrt.f32 %v700_v14  ;;  %v670_v16 = vmul.f32 0.0078125, %v622_v24  ;;  %v671_v2 = vmul.f32 0.0078125, %v624_v33 }
 0x1e4   : > { %2628 = vrsqrt.f32 %v701_v23  ;;  %v865_v34 = vpack.c.bf16 %v838_v41, %v837_v8  ;;  %v800_v37 = vmul.f32 %v3371_v31, %v761_v25 }
 0x1e5   : > { %v2623_v18 = vpop.eup %2622  ;;  %v702_v55 = vadd.f32 1e-05, %v670_v16  ;;  %v703_v38 = vadd.f32 1e-05, %v671_v2 }
 0x1e6   : > { %v626_v36 = vpop.xlane.xlu1 %625  ;;  %1058 = vmatmul.mubr.bf16.gmra.mrb[16].mxu0 %v865_v34  ;;  %v628_v26 = vpop.xlane.xlu0 %627  ;;  %v762_v50 = vmul.f32 %v2623_v18, %v3292_v10  ;;  %v839_v32 = vadd.f32 %v3383_v44, %v800_v37  ;;  %v2536_v18 = vld [vmem:[#allocation7] ss:$8 sps:$4 sm:$0xff]   ;;  %v2539_v37 = vld [vmem:[#allocation7 + $0x10] ss:$8 sps:$4 sm:$0xff]  }
 0x1e7   : > { %2630 = vrsqrt.f32 %v702_v55  ;;  %v672_v39 = vmul.f32 0.0078125, %v626_v36  ;;  %v673_v9 = vmul.f32 0.0078125, %v628_v26  ;;  %1067 = vmatprep.mubr.bf16.mxu0 %v2862_v60  ;;  %v2541_v26 = vld [vmem:[#allocation7 + $0x14] ss:$8 sps:$4 sm:$0xff]  }
 0x1e8   : > { %2632 = vrsqrt.f32 %v703_v38  ;;  %v801_v19 = vmul.f32 %v3371_v31, %v762_v50 }
 0x1e9   : > { %v2625_v62 = vpop.eup %2624  ;;  %v704_v52 = vadd.f32 1e-05, %v672_v39  ;;  %v705_v45 = vadd.f32 1e-05, %v673_v9  ;;  %v2542_v9 = vld [vmem:[#allocation7 + $0x20] ss:$8 sps:$4 sm:$0xff]  }
 0x1ea   : > { %v630_v49 = vpop.xlane.xlu1 %629  ;;  %v840_v53 = vadd.f32 %v3383_v44, %v801_v19  ;;  %v763_v10 = vmul.f32 %v2625_v62, %v3301_v11  ;;  %v2547_v62 = vld [vmem:[#allocation7 + $0x34] ss:$8 sps:$4 sm:$0xff]  }
 0x1eb   : > { %2634 = vrsqrt.f32 %v704_v52  ;;  %v674_v54 = vmul.f32 0.0078125, %v630_v49  ;;  %v2545_v52 = vld [vmem:[#allocation7 + $0x30] ss:$8 sps:$4 sm:$0xff]   ;;  %v2548_v49 = vld [vmem:[#allocation7 + $0x40] ss:$8 sps:$4 sm:$0xff]  }
 0x1ec   : > { %v866_v43 = vpack.c.bf16 %v840_v53, %v839_v32  ;;  %2636 = vrsqrt.f32 %v705_v45  ;;  %v802_v1 = vmul.f32 %v3371_v31, %v763_v10  ;;  %v2550_v45 = vld [vmem:[#allocation7 + $0x44] ss:$8 sps:$4 sm:$0xff]   ;;  %v2553_v32 = vld [vmem:[#allocation7 + $0x54] ss:$8 sps:$4 sm:$0xff]   ;;  %v2551_v53 = vld [vmem:[#allocation7 + $0x50] ss:$8 sps:$4 sm:$0xff]  }
 0x1ed   : > { %v2627_v56 = vpop.eup %2626  ;;  %v706_v63 = vadd.f32 1e-05, %v674_v54  ;;  %v2556_v10 = vld [vmem:[#allocation7 + $0x64] ss:$8 sps:$4 sm:$0xff]   ;;  %v2554_v54 = vld [vmem:[#allocation7 + $0x60] ss:$8 sps:$4 sm:$0xff]  }
 0x1ee   : > { %v2629_v0 = vpop.eup %2628  ;;  %1068 = vmatmul.mubr.bf16.gmra.mrb[20].mxu0 %v866_v43  ;;  %v764_v30 = vmul.f32 %v2627_v56, %v3311_v61  ;;  %v841_v48 = vadd.f32 %v3383_v44, %v802_v1  ;;  %v2559_v43 = vld [vmem:[#allocation7 + $0x74] ss:$8 sps:$4 sm:$0xff]   ;;  %v2557_v56 = vld [vmem:[#allocation7 + $0x70] ss:$8 sps:$4 sm:$0xff]  }
 0x1ef   : > { %2638 = vrsqrt.f32 %v706_v63  ;;  %1077 = vmatprep.mubr.bf16.mxu0 %v2862_v60  ;;  %v765_v11 = vmul.f32 %v2629_v0, %v3315_v12  ;;  %v2562_v63 = vld [vmem:[#allocation7 + $0x84] ss:$8 sps:$4 sm:$0xff]   ;;  %v2560_v0 = vld [vmem:[#allocation7 + $0x80] ss:$8 sps:$4 sm:$0xff]   ;;  %v2563_v1 = vld [vmem:[#allocation7 + $0x90] ss:$8 sps:$4 sm:$0xff]  }
 0x1f0   : > { %v803_v6 = vmul.f32 %v3371_v31, %v764_v30  ;;  %v2565_v30 = vld [vmem:[#allocation7 + $0x94] ss:$8 sps:$4 sm:$0xff]  }
 0x1f1   : > { %v2631_v3 = vpop.eup %2630  ;;  %v804_v33 = vmul.f32 %v3371_v31, %v765_v11  ;;  %v2571_v11 = vld [vmem:[#allocation7 + $0xb4] ss:$8 sps:$4 sm:$0xff]  }
 0x1f2   : > { %v2633_v35 = vpop.eup %2632  ;;  %v842_v4 = vadd.f32 %v3383_v44, %v803_v6  ;;  %v766_v13 = vmul.f32 %v2631_v3, %v3323_v7  ;;  %v2568_v6 = vld [vmem:[#allocation7 + $0xa4] ss:$8 sps:$4 sm:$0xff]   ;;  %v2566_v3 = vld [vmem:[#allocation7 + $0xa0] ss:$8 sps:$4 sm:$0xff]  }
 0x1f3   : > { %v767_v14 = vmul.f32 %v2633_v35, %v3329_v20  ;;  %v843_v20 = vadd.f32 %v3383_v44, %v804_v33  ;;  %v2569_v35 = vld [vmem:[#allocation7 + $0xb0] ss:$8 sps:$4 sm:$0xff]  }
 0x1f4   : > { %v867_v61 = vpack.c.bf16 %v842_v4, %v841_v48  ;;  %v805_v23 = vmul.f32 %v3371_v31, %v766_v13  ;;  %v2574_v48 = vld [vmem:[#allocation7 + $0xc4] ss:$8 sps:$4 sm:$0xff]   ;;  %v2572_v4 = vld [vmem:[#allocation7 + $0xc0] ss:$8 sps:$4 sm:$0xff]   ;;  %v2577_v13 = vld [vmem:[#allocation7 + $0xd4] ss:$8 sps:$4 sm:$0xff]  }
 0x1f5   : > { %v2635_v24 = vpop.eup %2634  ;;  %v806_v12 = vmul.f32 %v3371_v31, %v767_v14  ;;  %v2575_v14 = vld [vmem:[#allocation7 + $0xd0] ss:$8 sps:$4 sm:$0xff]  }
 0x1f6   : > { %1078 = vmatmul.mubr.bf16.gmra.mrb[24].mxu0 %v867_v61  ;;  %v768_v8 = vmul.f32 %v2635_v24, %v3336_v15  ;;  %v2637_v41 = vpop.eup %2636  ;;  %v844_v25 = vadd.f32 %v3383_v44, %v805_v23  ;;  %v2580_v61 = vld [vmem:[#allocation7 + $0xe4] ss:$8 sps:$4 sm:$0xff]   ;;  %v2578_v23 = vld [vmem:[#allocation7 + $0xe0] ss:$8 sps:$4 sm:$0xff]   ;;  %v2583_v24 = vld [vmem:[#allocation7 + $0xf4] ss:$8 sps:$4 sm:$0xff]  }
 0x1f7   : > { %1087 = vmatprep.mubr.bf16.mxu0 %v2862_v60  ;;  %v845_v2 = vadd.f32 %v3383_v44, %v806_v12  ;;  %v769_v34 = vmul.f32 %v2637_v41, %v3339_v27  ;;  %v2544_v27 = vld [vmem:[#allocation7 + $0x24] ss:$8 sps:$4 sm:$0xff]   ;;  %v2581_v33 = vld [vmem:[#allocation7 + $0xf0] ss:$8 sps:$4 sm:$0xff]  }
 0x1f8   : > { %v807_v7 = vmul.f32 %v3371_v31, %v768_v8  ;;  %v868_v55 = vpack.c.bf16 %v844_v25, %v843_v20 }
 0x1f9   : > { %v2639_v16 = vpop.eup %2638  ;;  %v808_v50 = vmul.f32 %v3371_v31, %v769_v34 }
 0x1fa   : > { %v846_v28 = vadd.f32 %v3383_v44, %v807_v7  ;;  %v770_v15 = vmul.f32 %v2639_v16, %v3344_v29 }
 0x1fb   : > { %v847_v29 = vadd.f32 %v3383_v44, %v808_v50 }
 0x1fc   : > { %v869_v38 = vpack.c.bf16 %v846_v28, %v845_v2  ;;  %v809_v36 = vmul.f32 %v3371_v31, %v770_v15 }
 0x1fe   : > { %1088 = vmatmul.mubr.bf16.gmra.mrb[28].mxu0 %v868_v55  ;;  %1098 = vmatmul.mubr.bf16.vlgmr.msra.gmra.mrb[0].mxu1 %v869_v38  ;;  %v848_v39 = vadd.f32 %v3383_v44, %v809_v36 }
 0x1ff   : > { %1107 = vmatprep.mubr.bf16.mxu1 %v2862_v60  ;;  %1479 = vmatpush1.bf16.msra.mxu1 %v2536_v18 }
 0x200   : > { %1480 = vmatprep.subr.bf16.mxu1 %v2541_v26  ;;  %v870_v19 = vpack.c.bf16 %v848_v39, %v847_v29 }
 0x203   : > { %1481 = vmatpush1.bf16.msra.mxu1 %v2539_v37 }
 0x204   : > { %1482 = vmatprep.subr.bf16.mxu1 %v2544_v27 }
 0x206   : > { %1108 = vmatmul.mubr.bf16.gmra.mrb[4].mxu1 %v870_v19 }
 0x207   : > { %1117 = vmatprep.mubr.bf16.mxu1 %v2862_v60  ;;  %1483 = vmatpush1.bf16.msra.mxu1 %v2542_v9 }
 0x208   : > { %1484 = vmatprep.subr.bf16.mxu1 %v2547_v62 }
 0x20b   : > { %1485 = vmatpush1.bf16.msra.mxu1 %v2545_v52 }
 0x20c   : > { %1486 = vmatprep.subr.bf16.mxu1 %v2550_v45 }
 0x20f   : > { %1487 = vmatpush1.bf16.msra.mxu1 %v2548_v49 }
 0x210   : > { %1488 = vmatprep.subr.bf16.mxu1 %v2553_v32 }
 0x213   : > { %1489 = vmatpush1.bf16.msra.mxu1 %v2551_v53 }
 0x214   : > { %1490 = vmatprep.subr.bf16.mxu1 %v2556_v10 }
 0x217   : > { %1491 = vmatpush1.bf16.msra.mxu1 %v2554_v54 }
 0x218   : > { %1492 = vmatprep.subr.bf16.mxu1 %v2559_v43 }
 0x21b   : > { %1493 = vmatpush1.bf16.msra.mxu1 %v2557_v56 }
 0x21c   : > { %1494 = vmatprep.subr.bf16.mxu1 %v2562_v63 }
 0x21f   : > { %1495 = vmatpush1.bf16.msra.mxu1 %v2560_v0 }
 0x220   : > { %1496 = vmatprep.subr.bf16.mxu1 %v2565_v30 }
 0x223   : > { %1497 = vmatpush1.bf16.msra.mxu1 %v2563_v1 }
 0x224   : > { %1498 = vmatprep.subr.bf16.mxu1 %v2568_v6 }
 0x227   : > { %1499 = vmatpush1.bf16.msra.mxu1 %v2566_v3 }
 0x228   : > { %1500 = vmatprep.subr.bf16.mxu1 %v2571_v11 }
 0x22b   : > { %1501 = vmatpush1.bf16.msra.mxu1 %v2569_v35 }
 0x22c   : > { %1502 = vmatprep.subr.bf16.mxu1 %v2574_v48 }
 0x22f   : > { %1503 = vmatpush1.bf16.msra.mxu1 %v2572_v4 }
 0x230   : > { %1504 = vmatprep.subr.bf16.mxu1 %v2577_v13 }
 0x233   : > { %1505 = vmatpush1.bf16.msra.mxu1 %v2575_v14 }
 0x234   : > { %1506 = vmatprep.subr.bf16.mxu1 %v2580_v61 }
 0x237   : > { %1507 = vmatpush1.bf16.msra.mxu1 %v2578_v23 }
 0x238   : > { %1508 = vmatprep.subr.bf16.mxu1 %v2583_v24 }
 0x23b   : > { %1509 = vmatpush1.bf16.msra.mxu1 %v2581_v33 }
 0x242   : > { %v632_v8 = vpop.xlane.xlu0 %631 }
 0x243   : > { %v675_v12 = vmul.f32 0.0078125, %v632_v8 }
 0x245   : > { %v707_v41 = vadd.f32 1e-05, %v675_v12 }
 0x246   : > { %v634_v25 = vpop.xlane.xlu1 %633 }
 0x247   : > { %2640 = vrsqrt.f32 %v707_v41  ;;  %v676_v7 = vmul.f32 0.0078125, %v634_v25 }
 0x249   : > { %v708_v16 = vadd.f32 1e-05, %v676_v7 }
 0x24a   : > { %v636_v20 = vpop.xlane.xlu0 %635 }
 0x24b   : > { %2642 = vrsqrt.f32 %v708_v16  ;;  %v677_v2 = vmul.f32 0.0078125, %v636_v20 }
 0x24d   : > { %v709_v28 = vadd.f32 1e-05, %v677_v2 }
 0x24e   : > { %v638_v34 = vpop.xlane.xlu1 %637 }
 0x24f   : > { %2644 = vrsqrt.f32 %v709_v28  ;;  %v678_v15 = vmul.f32 0.0078125, %v638_v34 }
 0x251   : > { %v2641_v18 = vpop.eup %2640  ;;  %v710_v55 = vadd.f32 1e-05, %v678_v15 }
 0x252   : > { %v640_v38 = vpop.xlane.xlu0 %639  ;;  %v771_v36 = vmul.f32 %v2641_v18, %v3353_v47 }
 0x253   : > { %2646 = vrsqrt.f32 %v710_v55  ;;  %v679_v26 = vmul.f32 0.0078125, %v640_v38 }
 0x254   : > { %v810_v29 = vmul.f32 %v3371_v31, %v771_v36 }
 0x255   : > { %v2643_v50 = vpop.eup %2642  ;;  %v711_v37 = vadd.f32 1e-05, %v679_v26 }
 0x256   : > { %v642_v39 = vpop.xlane.xlu1 %641  ;;  %v772_v27 = vmul.f32 %v2643_v50, %v3358_v57  ;;  %v849_v49 = vadd.f32 %v3383_v44, %v810_v29 }
 0x257   : > { %2648 = vrsqrt.f32 %v711_v37  ;;  %v680_v9 = vmul.f32 0.0078125, %v642_v39 }
 0x258   : > { %v811_v19 = vmul.f32 %v3371_v31, %v772_v27 }
 0x259   : > { %v2645_v62 = vpop.eup %2644  ;;  %v712_v52 = vadd.f32 1e-05, %v680_v9 }
 0x25a   : > { %v644_v45 = vpop.xlane.xlu0 %643  ;;  %v850_v47 = vadd.f32 %v3383_v44, %v811_v19  ;;  %v773_v32 = vmul.f32 %v2645_v62, %v3363_v21 }
 0x25b   : > { %2650 = vrsqrt.f32 %v712_v52  ;;  %v681_v53 = vmul.f32 0.0078125, %v644_v45 }
 0x25c   : > { %v871_v10 = vpack.c.bf16 %v850_v47, %v849_v49  ;;  %v812_v63 = vmul.f32 %v3371_v31, %v773_v32 }
 0x25d   : > { %v2647_v54 = vpop.eup %2646  ;;  %v713_v57 = vadd.f32 1e-05, %v681_v53 }
 0x25e   : > { %v646_v43 = vpop.xlane.xlu1 %645  ;;  %1118 = vmatmul.mubr.bf16.gmra.mrb[8].mxu1 %v871_v10  ;;  %v774_v56 = vmul.f32 %v2647_v54, %v3374_v46  ;;  %v851_v3 = vadd.f32 %v3383_v44, %v812_v63  ;;  %v895_v54 = vlaneseq }
 0x25f   : > { %2652 = vrsqrt.f32 %v713_v57  ;;  %v682_v0 = vmul.f32 0.0078125, %v646_v43  ;;  %1127 = vmatprep.mubr.bf16.mxu1 %v2862_v60 }
 0x260   : > { %v813_v30 = vmul.f32 %v3371_v31, %v774_v56  ;;  %v3532_v57 = vshrl.u32 %v895_v54, 7 }
 0x261   : > { %v2649_v1 = vpop.eup %2648  ;;  %v714_v6 = vadd.f32 1e-05, %v682_v0 }
 0x262   : > { %v648_v21 = vpop.xlane.xlu0 %647  ;;  %v852_v11 = vadd.f32 %v3383_v44, %v813_v30  ;;  %v775_v35 = vmul.f32 %v2649_v1, %v3387_v51  ;;  %v901_v43 = vsub.s32 1, %v3532_v57 }
 0x263   : > { %2654 = vrsqrt.f32 %v714_v6  ;;  %v683_v48 = vmul.f32 0.0078125, %v648_v21 }
 0x264   : > { %v872_v46 = vpack.c.bf16 %v852_v11, %v851_v3  ;;  %v814_v23 = vmul.f32 %v3371_v31, %v775_v35 }
 0x265   : > { %v2651_v4 = vpop.eup %2650  ;;  %v715_v13 = vadd.f32 1e-05, %v683_v48 }
 0x266   : > { %v650_v14 = vpop.xlane.xlu1 %649  ;;  %1128 = vmatmul.mubr.bf16.gmra.mrb[12].mxu1 %v872_v46  ;;  %v776_v61 = vmul.f32 %v2651_v4, %v3395_v59  ;;  %v853_v41 = vadd.f32 %v3383_v44, %v814_v23 }
 0x267   : > { %2656 = vrsqrt.f32 %v715_v13  ;;  %v684_v24 = vmul.f32 0.0078125, %v650_v14  ;;  %1137 = vmatprep.mubr.bf16.mxu1 %v2862_v60 }
 0x268   : > { %v815_v33 = vmul.f32 %v3371_v31, %v776_v61 }
 0x269   : > { %v2653_v8 = vpop.eup %2652  ;;  %v716_v12 = vadd.f32 1e-05, %v684_v24 }
 0x26a   : > { %v652_v51 = vpop.xlane.xlu0 %651  ;;  %v854_v25 = vadd.f32 %v3383_v44, %v815_v33  ;;  %v777_v7 = vmul.f32 %v2653_v8, %v3404_v17 }
 0x26b   : > { %2658 = vrsqrt.f32 %v716_v12  ;;  %v685_v16 = vmul.f32 0.0078125, %v652_v51 }
 0x26c   : > { %v873_v59 = vpack.c.bf16 %v854_v25, %v853_v41  ;;  %v816_v15 = vmul.f32 %v3371_v31, %v777_v7 }
 0x26d   : > { %v2655_v20 = vpop.eup %2654  ;;  %v717_v2 = vadd.f32 1e-05, %v685_v16 }
 0x26e   : > { %v654_v28 = vpop.xlane.xlu1 %653  ;;  %1138 = vmatmul.mubr.bf16.gmra.mrb[16].mxu1 %v873_v59  ;;  %v778_v34 = vmul.f32 %v2655_v20, %v3412_v22  ;;  %v855_v17 = vadd.f32 %v3383_v44, %v816_v15 }
 0x26f   : > { %2660 = vrsqrt.f32 %v717_v2  ;;  %v686_v18 = vmul.f32 0.0078125, %v654_v28  ;;  %1147 = vmatprep.mubr.bf16.mxu1 %v2862_v60 }
 0x270   : > { %v817_v55 = vmul.f32 %v3371_v31, %v778_v34 }
 0x271   : > { %v2657_v38 = vpop.eup %2656  ;;  %v718_v36 = vadd.f32 1e-05, %v686_v18 }
 0x272   : > { %v856_v26 = vadd.f32 %v3383_v44, %v817_v55  ;;  %v779_v50 = vmul.f32 %v2657_v38, %v3421_v5 }
 0x273   : > { %2662 = vrsqrt.f32 %v718_v36 }
 0x274   : > { %v874_v37 = vpack.c.bf16 %v856_v26, %v855_v17  ;;  %v818_v27 = vmul.f32 %v3371_v31, %v779_v50 }
 0x275   : > { %v2659_v39 = vpop.eup %2658 }
 0x276   : > { %1148 = vmatmul.mubr.bf16.gmra.mrb[20].mxu1 %v874_v37  ;;  %v780_v22 = vmul.f32 %v2659_v39, %v3429_v40  ;;  %v857_v19 = vadd.f32 %v3383_v44, %v818_v27 }
 0x277   : > { %1157 = vmatprep.mubr.bf16.mxu1 %v2862_v60 }
 0x278   : > { %v819_v29 = vmul.f32 %v3371_v31, %v780_v22 }
 0x279   : > { %v2661_v9 = vpop.eup %2660 }
 0x27a   : > { %v858_v62 = vadd.f32 %v3383_v44, %v819_v29  ;;  %v781_v52 = vmul.f32 %v2661_v9, %v3438_v42  ;;  %v897_v42 = vsub.s32 0, %v3532_v57 }
 0x27c   : > { %v875_v5 = vpack.c.bf16 %v858_v62, %v857_v19  ;;  %v820_v40 = vmul.f32 %v3371_v31, %v781_v52 }
 0x27d   : > { %v2663_v45 = vpop.eup %2662 }
 0x27e   : > { %1158 = vmatmul.mubr.bf16.gmra.mrb[24].mxu1 %v875_v5  ;;  %v782_v49 = vmul.f32 %v2663_v45, %v3446_v58  ;;  %v859_v32 = vadd.f32 %v3383_v44, %v820_v40  ;;  %v893_v58 = vld [vmem:[%s3814_s4] sm:$0x3] }
 0x27f   : > { %1167 = vmatprep.mubr.bf16.mxu1 %v2862_v60  ;;  %v3541_v60 = vrot.slane %v893_v58, %v897_v42 }
 0x280   : > { %v821_v47 = vmul.f32 %v3371_v31, %v782_v49  ;;  %v3545_v31 = vrot.slane %v893_v58, %v901_v43 }
 0x282   : > { %v860_v53 = vadd.f32 %v3383_v44, %v821_v47 }
 0x284   : > { %v876_v10 = vpack.c.bf16 %v860_v53, %v859_v32 }
 0x286   : > { %1168 = vmatmul.mubr.bf16.gmra.mrb[28].mxu1 %v876_v10 }
 0x299   : > { %v1019_v44 = vpop.f32.mrb[0].mxu0 }
 0x29a   : > { %v1020_v56 = vadd.f32 %v1019_v44, %v3541_v60  ;;  %v1021_v63 = vpop.f32.mrb[1].mxu0 }
 0x29b   : > { %v1022_v0 = vadd.f32 %v1021_v63, %v3545_v31  ;;  %v1023_v30 = vpop.f32.mrb[2].mxu0 }
 0x29c   : > { %v1024_v1 = vadd.f32 %v1023_v30, %v3541_v60  ;;  %v1025_v6 = vpop.f32.mrb[3].mxu0  ;;  %v1178_v3 = vmax.f32 %v1020_v56, 0.0 }
 0x29d   : > { %v1026_v21 = vadd.f32 %v1025_v6, %v3545_v31  ;;  %v1179_v35 = vmax.f32 %v1022_v0, 0.0 }
 0x29e   : > { %v1180_v11 = vmax.f32 %v1024_v1, 0.0 }
 0x29f   : > { %v1181_v48 = vmax.f32 %v1026_v21, 0.0 }
 0x2a0   : > { %v1242_v46 = vpack.c.bf16 %v1180_v11, %v1178_v3 }
 0x2a1   : > { %v1243_v4 = vpack.c.bf16 %v1181_v48, %v1179_v35  ;;  %v1029_v13 = vpop.f32.mrb[4].mxu0 }
 0x2a2   : > { %v1030_v14 = vadd.f32 %v1029_v13, %v3541_v60  ;;  %v1031_v61 = vpop.f32.mrb[5].mxu0 }
 0x2a3   : > { %v1032_v23 = vadd.f32 %v1031_v61, %v3545_v31  ;;  %v1033_v24 = vpop.f32.mrb[6].mxu0  ;;  %1510 = vmatprep.mubr.bf16.mxu1 %v1243_v4 }
 0x2a4   : > { %v1034_v33 = vadd.f32 %v1033_v24, %v3541_v60  ;;  %v1035_v8 = vpop.f32.mrb[7].mxu0  ;;  %1511 = vmatmul.mubr.bf16.vlgmr.msra.gmra.mrb[32].mxu1 %v1242_v46  ;;  %v1182_v51 = vmax.f32 %v1030_v14, 0.0 }
 0x2a5   : > { %v1036_v12 = vadd.f32 %v1035_v8, %v3545_v31  ;;  %v1183_v25 = vmax.f32 %v1032_v23, 0.0 }
 0x2a6   : > { %v1184_v41 = vmax.f32 %v1034_v33, 0.0 }
 0x2a7   : > { %v1185_v7 = vmax.f32 %v1036_v12, 0.0 }
 0x2a8   : > { %v1244_v16 = vpack.c.bf16 %v1184_v41, %v1182_v51 }
 0x2a9   : > { %v1245_v59 = vpack.c.bf16 %v1185_v7, %v1183_v25  ;;  %v1039_v20 = vpop.f32.mrb[8].mxu0 }
 0x2aa   : > { %v1040_v2 = vadd.f32 %v1039_v20, %v3541_v60  ;;  %v1041_v28 = vpop.f32.mrb[9].mxu0 }
 0x2ab   : > { %v1042_v34 = vadd.f32 %v1041_v28, %v3545_v31  ;;  %v1043_v15 = vpop.f32.mrb[10].mxu0  ;;  %1520 = vmatprep.mubr.bf16.mxu1 %v1245_v59 }
 0x2ac   : > { %v1044_v18 = vadd.f32 %v1043_v15, %v3541_v60  ;;  %v1045_v55 = vpop.f32.mrb[11].mxu0  ;;  %1521 = vmatmul.mubr.bf16.gmra.mrb[36].mxu1 %v1244_v16  ;;  %v1186_v36 = vmax.f32 %v1040_v2, 0.0 }
 0x2ad   : > { %v1046_v38 = vadd.f32 %v1045_v55, %v3545_v31  ;;  %v1187_v26 = vmax.f32 %v1042_v34, 0.0 }
 0x2ae   : > { %v1188_v17 = vmax.f32 %v1044_v18, 0.0 }
 0x2af   : > { %v1189_v50 = vmax.f32 %v1046_v38, 0.0 }
 0x2b0   : > { %v1246_v37 = vpack.c.bf16 %v1188_v17, %v1186_v36 }
 0x2b1   : > { %v1247_v39 = vpack.c.bf16 %v1189_v50, %v1187_v26  ;;  %v1049_v22 = vpop.f32.mrb[12].mxu0 }
 0x2b2   : > { %v1050_v27 = vadd.f32 %v1049_v22, %v3541_v60  ;;  %v1051_v29 = vpop.f32.mrb[13].mxu0 }
 0x2b3   : > { %v1052_v9 = vadd.f32 %v1051_v29, %v3545_v31  ;;  %v1053_v19 = vpop.f32.mrb[14].mxu0  ;;  %1530 = vmatprep.mubr.bf16.mxu1 %v1247_v39 }
 0x2b4   : > { %v1054_v62 = vadd.f32 %v1053_v19, %v3541_v60  ;;  %v1055_v52 = vpop.f32.mrb[15].mxu0  ;;  %1531 = vmatmul.mubr.bf16.gmra.mrb[40].mxu1 %v1246_v37  ;;  %v1190_v45 = vmax.f32 %v1050_v27, 0.0 }
 0x2b5   : > { %v1056_v5 = vadd.f32 %v1055_v52, %v3545_v31  ;;  %v1191_v40 = vmax.f32 %v1052_v9, 0.0 }
 0x2b6   : > { %v1192_v49 = vmax.f32 %v1054_v62, 0.0 }
 0x2b7   : > { %v1193_v47 = vmax.f32 %v1056_v5, 0.0 }
 0x2b8   : > { %v1248_v32 = vpack.c.bf16 %v1192_v49, %v1190_v45 }
 0x2b9   : > { %v1249_v53 = vpack.c.bf16 %v1193_v47, %v1191_v40  ;;  %v1059_v10 = vpop.f32.mrb[16].mxu0 }
 0x2ba   : > { %v1060_v54 = vadd.f32 %v1059_v10, %v3541_v60  ;;  %v1061_v58 = vpop.f32.mrb[17].mxu0 }
 0x2bb   : > { %v1062_v44 = vadd.f32 %v1061_v58, %v3545_v31  ;;  %v1063_v56 = vpop.f32.mrb[18].mxu0  ;;  %1540 = vmatprep.mubr.bf16.mxu1 %v1249_v53 }
 0x2bc   : > { %v1064_v63 = vadd.f32 %v1063_v56, %v3541_v60  ;;  %v1065_v0 = vpop.f32.mrb[19].mxu0  ;;  %1541 = vmatmul.mubr.bf16.gmra.mrb[44].mxu1 %v1248_v32  ;;  %v1194_v1 = vmax.f32 %v1060_v54, 0.0 }
 0x2bd   : > { %v1066_v30 = vadd.f32 %v1065_v0, %v3545_v31  ;;  %v1195_v21 = vmax.f32 %v1062_v44, 0.0 }
 0x2be   : > { %v1196_v6 = vmax.f32 %v1064_v63, 0.0 }
 0x2bf   : > { %v1197_v3 = vmax.f32 %v1066_v30, 0.0 }
 0x2c0   : > { %v1250_v11 = vpack.c.bf16 %v1196_v6, %v1194_v1 }
 0x2c1   : > { %v1251_v35 = vpack.c.bf16 %v1197_v3, %v1195_v21  ;;  %v1069_v48 = vpop.f32.mrb[20].mxu0 }
 0x2c2   : > { %v1070_v46 = vadd.f32 %v1069_v48, %v3541_v60  ;;  %v1071_v4 = vpop.f32.mrb[21].mxu0 }
 0x2c3   : > { %v1072_v13 = vadd.f32 %v1071_v4, %v3545_v31  ;;  %v1073_v14 = vpop.f32.mrb[22].mxu0  ;;  %1550 = vmatprep.mubr.bf16.mxu1 %v1251_v35 }
 0x2c4   : > { %v1074_v61 = vadd.f32 %v1073_v14, %v3541_v60  ;;  %v1075_v23 = vpop.f32.mrb[23].mxu0  ;;  %1551 = vmatmul.mubr.bf16.gmra.mrb[48].mxu1 %v1250_v11  ;;  %v1198_v33 = vmax.f32 %v1070_v46, 0.0 }
 0x2c5   : > { %v1076_v24 = vadd.f32 %v1075_v23, %v3545_v31  ;;  %v1199_v12 = vmax.f32 %v1072_v13, 0.0 }
 0x2c6   : > { %v1200_v8 = vmax.f32 %v1074_v61, 0.0 }
 0x2c7   : > { %v1201_v51 = vmax.f32 %v1076_v24, 0.0 }
 0x2c8   : > { %v1252_v41 = vpack.c.bf16 %v1200_v8, %v1198_v33 }
 0x2c9   : > { %v1253_v25 = vpack.c.bf16 %v1201_v51, %v1199_v12  ;;  %v1079_v7 = vpop.f32.mrb[24].mxu0  ;;  %v2584_v51 = vld [vmem:[#allocation8 + $0x40] sm:$0xff]  }
 0x2ca   : > { %v1080_v16 = vadd.f32 %v1079_v7, %v3541_v60  ;;  %v1081_v59 = vpop.f32.mrb[25].mxu0  ;;  %2300 = vmatprep.subr.bf16.mxu0 %v2584_v51  ;;  %v2587_v7 = vld [vmem:[#allocation8 + $0x8] sm:$0xff]  }
 0x2cb   : > { %v1082_v20 = vadd.f32 %v1081_v59, %v3545_v31  ;;  %v1083_v2 = vpop.f32.mrb[26].mxu0  ;;  %1560 = vmatprep.mubr.bf16.mxu1 %v1253_v25  ;;  %v2586_v25 = vld [vmem:[#allocation8 + $0x48] sm:$0xff]   ;;  %v2589_v59 = vld [vmem:[#allocation8 + $0x10] sm:$0xff]  }
 0x2cc   : > { %v1084_v28 = vadd.f32 %v1083_v2, %v3541_v60  ;;  %v1085_v34 = vpop.f32.mrb[27].mxu0  ;;  %1561 = vmatmul.mubr.bf16.gmra.mrb[52].mxu1 %v1252_v41  ;;  %v1202_v18 = vmax.f32 %v1080_v16, 0.0  ;;  %v2585_v41 = vld [vmem:[#allocation8] sm:$0xff]   ;;  %v2588_v16 = vld [vmem:[#allocation8 + $0x50] sm:$0xff]   ;;  %v2591_v2 = vld [vmem:[#allocation8 + $0x18] sm:$0xff]  }
 0x2cd   : > { %v1086_v15 = vadd.f32 %v1085_v34, %v3545_v31  ;;  %v1203_v38 = vmax.f32 %v1082_v20, 0.0  ;;  %2301 = vmatpush3.bf16.msra.mxu0 %v2585_v41  ;;  %v2590_v20 = vld [vmem:[#allocation8 + $0x58] sm:$0xff]   ;;  %v2593_v34 = vld [vmem:[#allocation8 + $0x20] sm:$0xff]  }
 0x2ce   : > { %v1204_v55 = vmax.f32 %v1084_v28, 0.0  ;;  %2302 = vmatprep.subr.bf16.mxu0 %v2586_v25  ;;  %v2592_v28 = vld [vmem:[#allocation8 + $0x60] sm:$0xff]  }
 0x2cf   : > { %v1205_v36 = vmax.f32 %v1086_v15, 0.0  ;;  %v2594_v15 = vld [vmem:[#allocation8 + $0x68] sm:$0xff]  }
 0x2d0   : > { %v1254_v17 = vpack.c.bf16 %v1204_v55, %v1202_v18  ;;  %v2595_v18 = vld [vmem:[#allocation8 + $0x28] sm:$0xff]   ;;  %v2596_v55 = vld [vmem:[#allocation8 + $0x70] sm:$0xff]  }
 0x2d1   : > { %v1255_v26 = vpack.c.bf16 %v1205_v36, %v1203_v38  ;;  %v1089_v50 = vpop.f32.mrb[28].mxu0  ;;  %v1099_v37 = vpop.f32.mrb[0].mxu1  ;;  %2303 = vmatpush3.bf16.msra.mxu0 %v2587_v7  ;;  %v2597_v38 = vld [vmem:[#allocation8 + $0x30] sm:$0xff]   ;;  %v2598_v36 = vld [vmem:[#allocation8 + $0x78] sm:$0xff]  }
 0x2d2   : > { %v1090_v39 = vadd.f32 %v1089_v50, %v3541_v60  ;;  %v1100_v22 = vadd.f32 %v1099_v37, %v3541_v60  ;;  %v1091_v27 = vpop.f32.mrb[29].mxu0  ;;  %v1101_v29 = vpop.f32.mrb[1].mxu1  ;;  %2304 = vmatprep.subr.bf16.mxu0 %v2588_v16 }
 0x2d3   : > { %v1092_v9 = vadd.f32 %v1091_v27, %v3545_v31  ;;  %v1102_v19 = vadd.f32 %v1101_v29, %v3545_v31  ;;  %v1093_v62 = vpop.f32.mrb[30].mxu0  ;;  %v1103_v52 = vpop.f32.mrb[2].mxu1  ;;  %1570 = vmatprep.mubr.bf16.mxu1 %v1255_v26 }
 0x2d4   : > { %v1094_v5 = vadd.f32 %v1093_v62, %v3541_v60  ;;  %v1104_v45 = vadd.f32 %v1103_v52, %v3541_v60  ;;  %v1095_v49 = vpop.f32.mrb[31].mxu0  ;;  %v1105_v40 = vpop.f32.mrb[3].mxu1  ;;  %1571 = vmatmul.mubr.bf16.gmra.mrb[56].mxu1 %v1254_v17  ;;  %v1206_v53 = vmax.f32 %v1090_v39, 0.0  ;;  %v1210_v10 = vmax.f32 %v1100_v22, 0.0  ;;  %v2599_v17 = vld [vmem:[#allocation8 + $0x38] sm:$0xff]  }
 0x2d5   : > { %v1096_v47 = vadd.f32 %v1095_v49, %v3545_v31  ;;  %v1106_v32 = vadd.f32 %v1105_v40, %v3545_v31  ;;  %v1207_v44 = vmax.f32 %v1092_v9, 0.0  ;;  %v1211_v56 = vmax.f32 %v1102_v19, 0.0  ;;  %2305 = vmatpush3.bf16.msra.mxu0 %v2589_v59 }
 0x2d6   : > { %v1208_v54 = vmax.f32 %v1094_v5, 0.0  ;;  %v1212_v58 = vmax.f32 %v1104_v45, 0.0  ;;  %2306 = vmatprep.subr.bf16.mxu0 %v2590_v20 }
 0x2d7   : > { %v1209_v63 = vmax.f32 %v1096_v47, 0.0  ;;  %v1213_v0 = vmax.f32 %v1106_v32, 0.0 }
 0x2d8   : > { %v1256_v30 = vpack.c.bf16 %v1208_v54, %v1206_v53  ;;  %v1258_v1 = vpack.c.bf16 %v1212_v58, %v1210_v10 }
 0x2d9   : > { %v1257_v6 = vpack.c.bf16 %v1209_v63, %v1207_v44  ;;  %v1259_v21 = vpack.c.bf16 %v1213_v0, %v1211_v56  ;;  %v1109_v3 = vpop.f32.mrb[4].mxu1  ;;  %2307 = vmatpush3.bf16.msra.mxu0 %v2591_v2 }
 0x2da   : > { %v1110_v11 = vadd.f32 %v1109_v3, %v3541_v60  ;;  %v1111_v35 = vpop.f32.mrb[5].mxu1  ;;  %2308 = vmatprep.subr.bf16.mxu0 %v2592_v28 }
 0x2db   : > { %v1112_v48 = vadd.f32 %v1111_v35, %v3545_v31  ;;  %v1113_v46 = vpop.f32.mrb[6].mxu1  ;;  %1580 = vmatprep.mubr.bf16.mxu1 %v1257_v6 }
 0x2dc   : > { %v1114_v4 = vadd.f32 %v1113_v46, %v3541_v60  ;;  %v1115_v13 = vpop.f32.mrb[7].mxu1  ;;  %1581 = vmatmul.mubr.bf16.gmra.mrb[60].mxu1 %v1256_v30  ;;  %v1214_v61 = vmax.f32 %v1110_v11, 0.0 }
 0x2dd   : > { %v1116_v14 = vadd.f32 %v1115_v13, %v3545_v31  ;;  %1590 = vmatprep.mubr.bf16.mxu1 %v1259_v21  ;;  %v1215_v24 = vmax.f32 %v1112_v48, 0.0  ;;  %2309 = vmatpush3.bf16.msra.mxu0 %v2593_v34 }
 0x2de   : > { %v1216_v23 = vmax.f32 %v1114_v4, 0.0  ;;  %2310 = vmatprep.subr.bf16.mxu0 %v2594_v15 }
 0x2df   : > { %v1217_v33 = vmax.f32 %v1116_v14, 0.0 }
 0x2e0   : > { %v1260_v8 = vpack.c.bf16 %v1216_v23, %v1214_v61 }
 0x2e1   : > { %v1261_v12 = vpack.c.bf16 %v1217_v33, %v1215_v24  ;;  %2311 = vmatpush3.bf16.msra.mxu0 %v2595_v18 }
 0x2e2   : > { %2312 = vmatprep.subr.bf16.mxu0 %v2596_v55 }
 0x2e4   : > { %1591 = vmatmul.mubr.bf16.gmra.mrb[64].mxu1 %v1258_v1 }
 0x2e5   : > { %1600 = vmatprep.mubr.bf16.mxu1 %v1261_v12  ;;  %2313 = vmatpush3.bf16.msra.mxu0 %v2597_v38 }
 0x2e6   : > { %2314 = vmatprep.subr.bf16.mxu0 %v2598_v36 }
 0x2e9   : > { %2315 = vmatpush3.bf16.msra.mxu0 %v2599_v17 }
 0x2ec   : > { %1601 = vmatmul.mubr.bf16.gmra.mrb[68].mxu1 %v1260_v8 }
 0x331   : > { %v1119_v26 = vpop.f32.mrb[8].mxu1 }
 0x332   : > { %v1120_v50 = vadd.f32 %v1119_v26, %v3541_v60  ;;  %v1121_v37 = vpop.f32.mrb[9].mxu1 }
 0x333   : > { %v1122_v39 = vadd.f32 %v1121_v37, %v3545_v31  ;;  %v1123_v22 = vpop.f32.mrb[10].mxu1 }
 0x334   : > { %v1124_v27 = vadd.f32 %v1123_v22, %v3541_v60  ;;  %v1125_v29 = vpop.f32.mrb[11].mxu1  ;;  %v1218_v19 = vmax.f32 %v1120_v50, 0.0 }
 0x335   : > { %v1126_v9 = vadd.f32 %v1125_v29, %v3545_v31  ;;  %v1219_v52 = vmax.f32 %v1122_v39, 0.0 }
 0x336   : > { %v1220_v62 = vmax.f32 %v1124_v27, 0.0 }
 0x337   : > { %v1221_v5 = vmax.f32 %v1126_v9, 0.0 }
 0x338   : > { %v1262_v45 = vpack.c.bf16 %v1220_v62, %v1218_v19 }
 0x339   : > { %v1263_v49 = vpack.c.bf16 %v1221_v5, %v1219_v52  ;;  %v1129_v40 = vpop.f32.mrb[12].mxu1 }
 0x33a   : > { %v1130_v47 = vadd.f32 %v1129_v40, %v3541_v60  ;;  %v1131_v32 = vpop.f32.mrb[13].mxu1 }
 0x33b   : > { %v1132_v53 = vadd.f32 %v1131_v32, %v3545_v31  ;;  %v1133_v10 = vpop.f32.mrb[14].mxu1  ;;  %1610 = vmatprep.mubr.bf16.mxu1 %v1263_v49 }
 0x33c   : > { %v1134_v54 = vadd.f32 %v1133_v10, %v3541_v60  ;;  %v1135_v58 = vpop.f32.mrb[15].mxu1  ;;  %1611 = vmatmul.mubr.bf16.gmra.mrb[72].mxu1 %v1262_v45  ;;  %v1222_v56 = vmax.f32 %v1130_v47, 0.0 }
 0x33d   : > { %v1136_v44 = vadd.f32 %v1135_v58, %v3545_v31  ;;  %v1223_v0 = vmax.f32 %v1132_v53, 0.0 }
 0x33e   : > { %v1224_v63 = vmax.f32 %v1134_v54, 0.0 }
 0x33f   : > { %v1225_v30 = vmax.f32 %v1136_v44, 0.0 }
 0x340   : > { %v1264_v1 = vpack.c.bf16 %v1224_v63, %v1222_v56 }
 0x341   : > { %v1265_v6 = vpack.c.bf16 %v1225_v30, %v1223_v0  ;;  %v1139_v21 = vpop.f32.mrb[16].mxu1  ;;  %v1306_v30 = vld [vmem:[%s3816_s6] sm:$0x3] }
 0x342   : > { %v1140_v3 = vadd.f32 %v1139_v21, %v3541_v60  ;;  %v1141_v11 = vpop.f32.mrb[17].mxu1 }
 0x343   : > { %v1142_v35 = vadd.f32 %v1141_v11, %v3545_v31  ;;  %v1143_v48 = vpop.f32.mrb[18].mxu1  ;;  %1620 = vmatprep.mubr.bf16.mxu1 %v1265_v6 }
 0x344   : > { %v1144_v46 = vadd.f32 %v1143_v48, %v3541_v60  ;;  %v1145_v4 = vpop.f32.mrb[19].mxu1  ;;  %1621 = vmatmul.mubr.bf16.gmra.mrb[76].mxu1 %v1264_v1  ;;  %v1226_v14 = vmax.f32 %v1140_v3, 0.0  ;;  %v3616_v1 = vrot.slane %v1306_v30, %v897_v42 }
 0x345   : > { %v1146_v13 = vadd.f32 %v1145_v4, %v3545_v31  ;;  %v1227_v23 = vmax.f32 %v1142_v35, 0.0 }
 0x346   : > { %v1228_v61 = vmax.f32 %v1144_v46, 0.0 }
 0x347   : > { %v1229_v24 = vmax.f32 %v1146_v13, 0.0 }
 0x348   : > { %v1266_v33 = vpack.c.bf16 %v1228_v61, %v1226_v14 }
 0x349   : > { %v1267_v8 = vpack.c.bf16 %v1229_v24, %v1227_v23  ;;  %v1149_v12 = vpop.f32.mrb[20].mxu1 }
 0x34a   : > { %v1150_v51 = vadd.f32 %v1149_v12, %v3541_v60  ;;  %v1151_v41 = vpop.f32.mrb[21].mxu1 }
 0x34b   : > { %v1152_v25 = vadd.f32 %v1151_v41, %v3545_v31  ;;  %v1153_v7 = vpop.f32.mrb[22].mxu1  ;;  %1630 = vmatprep.mubr.bf16.mxu1 %v1267_v8 }
 0x34c   : > { %v1154_v16 = vadd.f32 %v1153_v7, %v3541_v60  ;;  %v1155_v59 = vpop.f32.mrb[23].mxu1  ;;  %1631 = vmatmul.mubr.bf16.gmra.mrb[80].mxu1 %v1266_v33  ;;  %v1230_v2 = vmax.f32 %v1150_v51, 0.0 }
 0x34d   : > { %v1156_v20 = vadd.f32 %v1155_v59, %v3545_v31  ;;  %v1231_v34 = vmax.f32 %v1152_v25, 0.0 }
 0x34e   : > { %v1232_v28 = vmax.f32 %v1154_v16, 0.0 }
 0x34f   : > { %v1233_v15 = vmax.f32 %v1156_v20, 0.0 }
 0x350   : > { %v1268_v18 = vpack.c.bf16 %v1232_v28, %v1230_v2 }
 0x351   : > { %v1269_v55 = vpack.c.bf16 %v1233_v15, %v1231_v34  ;;  %v1159_v38 = vpop.f32.mrb[24].mxu1 }
 0x352   : > { %v1160_v36 = vadd.f32 %v1159_v38, %v3541_v60  ;;  %v1161_v17 = vpop.f32.mrb[25].mxu1 }
 0x353   : > { %v1162_v26 = vadd.f32 %v1161_v17, %v3545_v31  ;;  %v1163_v50 = vpop.f32.mrb[26].mxu1  ;;  %1640 = vmatprep.mubr.bf16.mxu1 %v1269_v55 }
 0x354   : > { %v1164_v37 = vadd.f32 %v1163_v50, %v3541_v60  ;;  %v1165_v39 = vpop.f32.mrb[27].mxu1  ;;  %1641 = vmatmul.mubr.bf16.gmra.mrb[84].mxu1 %v1268_v18  ;;  %v1234_v27 = vmax.f32 %v1160_v36, 0.0 }
 0x355   : > { %v1166_v22 = vadd.f32 %v1165_v39, %v3545_v31  ;;  %v1235_v9 = vmax.f32 %v1162_v26, 0.0 }
 0x356   : > { %v1236_v29 = vmax.f32 %v1164_v37, 0.0 }
 0x357   : > { %v1237_v19 = vmax.f32 %v1166_v22, 0.0 }
 0x358   : > { %v1270_v62 = vpack.c.bf16 %v1236_v29, %v1234_v27 }
 0x359   : > { %v1271_v52 = vpack.c.bf16 %v1237_v19, %v1235_v9  ;;  %v1169_v5 = vpop.f32.mrb[28].mxu1 }
 0x35a   : > { %v1170_v45 = vadd.f32 %v1169_v5, %v3541_v60  ;;  %v1171_v49 = vpop.f32.mrb[29].mxu1 }
 0x35b   : > { %v1172_v40 = vadd.f32 %v1171_v49, %v3545_v31  ;;  %v1173_v47 = vpop.f32.mrb[30].mxu1  ;;  %1650 = vmatprep.mubr.bf16.mxu1 %v1271_v52 }
 0x35c   : > { %v1174_v32 = vadd.f32 %v1173_v47, %v3541_v60  ;;  %v1175_v53 = vpop.f32.mrb[31].mxu1  ;;  %1651 = vmatmul.mubr.bf16.gmra.mrb[88].mxu1 %v1270_v62  ;;  %v1238_v54 = vmax.f32 %v1170_v45, 0.0  ;;  %v3620_v60 = vrot.slane %v1306_v30, %v901_v43 }
 0x35d   : > { %v1176_v10 = vadd.f32 %v1175_v53, %v3545_v31  ;;  %v1239_v44 = vmax.f32 %v1172_v40, 0.0 }
 0x35e   : > { %v1240_v58 = vmax.f32 %v1174_v32, 0.0 }
 0x35f   : > { %v1241_v56 = vmax.f32 %v1176_v10, 0.0 }
 0x360   : > { %v1272_v63 = vpack.c.bf16 %v1240_v58, %v1238_v54 }
 0x361   : > { %v1273_v0 = vpack.c.bf16 %v1241_v56, %v1239_v44 }
 0x363   : > { %1660 = vmatprep.mubr.bf16.mxu1 %v1273_v0 }
 0x364   : > { %1661 = vmatmul.mubr.bf16.gmra.mrb[92].mxu1 %v1272_v63 }
 0x377   : > { %v1512_v31 = vpop.f32.mrb[32].mxu1 }
 0x378   : > { %v1513_v6 = vadd.f32 %v1512_v31, %v3616_v1  ;;  %v1514_v21 = vpop.f32.mrb[33].mxu1 }
 0x379   : > { %v1515_v3 = vadd.f32 %v1514_v21, %v3620_v60  ;;  %v1516_v11 = vpop.f32.mrb[34].mxu1 }
 0x37a   : > { %v1517_v35 = vadd.f32 %v1516_v11, %v3616_v1  ;;  %v1518_v48 = vpop.f32.mrb[35].mxu1  ;;  %v1671_v4 = vmax.f32 %v1513_v6, 0.0 }
 0x37b   : > { %v1519_v46 = vadd.f32 %v1518_v48, %v3620_v60  ;;  %v1672_v42 = vmax.f32 %v1515_v3, 0.0 }
 0x37c   : > { %v1673_v13 = vmax.f32 %v1517_v35, 0.0 }
 0x37d   : > { %v1674_v14 = vmax.f32 %v1519_v46, 0.0 }
 0x37e   : > { %v1735_v61 = vpack.c.bf16 %v1673_v13, %v1671_v4 }
 0x37f   : > { %v1736_v57 = vpack.c.bf16 %v1674_v14, %v1672_v42  ;;  %v1522_v43 = vpop.f32.mrb[36].mxu1 }
 0x380   : > { %v1523_v23 = vadd.f32 %v1522_v43, %v3616_v1  ;;  %v1524_v24 = vpop.f32.mrb[37].mxu1 }
 0x381   : > { %v1525_v33 = vadd.f32 %v1524_v24, %v3620_v60  ;;  %v1526_v8 = vpop.f32.mrb[38].mxu1  ;;  %1934 = vmatprep.mubr.bf16.mxu0 %v1736_v57 }
 0x382   : > { %v1527_v12 = vadd.f32 %v1526_v8, %v3616_v1  ;;  %v1528_v51 = vpop.f32.mrb[39].mxu1  ;;  %1935 = vmatmul.mubr.bf16.vlgmr.msra.gmra.mrb[32].mxu0 %v1735_v61  ;;  %v1675_v25 = vmax.f32 %v1523_v23, 0.0 }
 0x383   : > { %v1529_v41 = vadd.f32 %v1528_v51, %v3620_v60  ;;  %v1676_v16 = vmax.f32 %v1525_v33, 0.0 }
 0x384   : > { %v1677_v7 = vmax.f32 %v1527_v12, 0.0 }
 0x385   : > { %v1678_v59 = vmax.f32 %v1529_v41, 0.0 }
 0x386   : > { %v1737_v20 = vpack.c.bf16 %v1677_v7, %v1675_v25 }
 0x387   : > { %v1738_v2 = vpack.c.bf16 %v1678_v59, %v1676_v16  ;;  %v1532_v28 = vpop.f32.mrb[40].mxu1 }
 0x388   : > { %v1533_v34 = vadd.f32 %v1532_v28, %v3616_v1  ;;  %v1534_v15 = vpop.f32.mrb[41].mxu1 }
 0x389   : > { %v1535_v18 = vadd.f32 %v1534_v15, %v3620_v60  ;;  %v1536_v55 = vpop.f32.mrb[42].mxu1  ;;  %1942 = vmatprep.mubr.bf16.mxu0 %v1738_v2 }
 0x38a   : > { %v1537_v38 = vadd.f32 %v1536_v55, %v3616_v1  ;;  %v1538_v36 = vpop.f32.mrb[43].mxu1  ;;  %1943 = vmatmul.mubr.bf16.gmra.mrb[36].mxu0 %v1737_v20  ;;  %v1679_v26 = vmax.f32 %v1533_v34, 0.0 }
 0x38b   : > { %v1539_v17 = vadd.f32 %v1538_v36, %v3620_v60  ;;  %v1680_v37 = vmax.f32 %v1535_v18, 0.0 }
 0x38c   : > { %v1681_v50 = vmax.f32 %v1537_v38, 0.0 }
 0x38d   : > { %v1682_v39 = vmax.f32 %v1539_v17, 0.0 }
 0x38e   : > { %v1739_v22 = vpack.c.bf16 %v1681_v50, %v1679_v26 }
 0x38f   : > { %v1740_v27 = vpack.c.bf16 %v1682_v39, %v1680_v37  ;;  %v1542_v29 = vpop.f32.mrb[44].mxu1 }
 0x390   : > { %v1543_v9 = vadd.f32 %v1542_v29, %v3616_v1  ;;  %v1544_v19 = vpop.f32.mrb[45].mxu1 }
 0x391   : > { %v1545_v62 = vadd.f32 %v1544_v19, %v3620_v60  ;;  %v1546_v52 = vpop.f32.mrb[46].mxu1  ;;  %1950 = vmatprep.mubr.bf16.mxu0 %v1740_v27 }
 0x392   : > { %v1547_v5 = vadd.f32 %v1546_v52, %v3616_v1  ;;  %v1548_v45 = vpop.f32.mrb[47].mxu1  ;;  %1951 = vmatmul.mubr.bf16.gmra.mrb[40].mxu0 %v1739_v22  ;;  %v1683_v40 = vmax.f32 %v1543_v9, 0.0 }
 0x393   : > { %v1549_v49 = vadd.f32 %v1548_v45, %v3620_v60  ;;  %v1684_v32 = vmax.f32 %v1545_v62, 0.0 }
 0x394   : > { %v1685_v47 = vmax.f32 %v1547_v5, 0.0 }
 0x395   : > { %v1686_v53 = vmax.f32 %v1549_v49, 0.0 }
 0x396   : > { %v1741_v10 = vpack.c.bf16 %v1685_v47, %v1683_v40 }
 0x397   : > { %v1742_v54 = vpack.c.bf16 %v1686_v53, %v1684_v32  ;;  %v1552_v58 = vpop.f32.mrb[48].mxu1 }
 0x398   : > { %v1553_v44 = vadd.f32 %v1552_v58, %v3616_v1  ;;  %v1554_v56 = vpop.f32.mrb[49].mxu1 }
 0x399   : > { %v1555_v63 = vadd.f32 %v1554_v56, %v3620_v60  ;;  %v1556_v0 = vpop.f32.mrb[50].mxu1  ;;  %1958 = vmatprep.mubr.bf16.mxu0 %v1742_v54 }
 0x39a   : > { %v1557_v30 = vadd.f32 %v1556_v0, %v3616_v1  ;;  %v1558_v31 = vpop.f32.mrb[51].mxu1  ;;  %1959 = vmatmul.mubr.bf16.gmra.mrb[44].mxu0 %v1741_v10  ;;  %v1687_v21 = vmax.f32 %v1553_v44, 0.0 }
 0x39b   : > { %v1559_v6 = vadd.f32 %v1558_v31, %v3620_v60  ;;  %v1688_v11 = vmax.f32 %v1555_v63, 0.0 }
 0x39c   : > { %v1689_v3 = vmax.f32 %v1557_v30, 0.0 }
 0x39d   : > { %v1690_v35 = vmax.f32 %v1559_v6, 0.0 }
 0x39e   : > { %v1743_v48 = vpack.c.bf16 %v1689_v3, %v1687_v21 }
 0x39f   : > { %v1744_v46 = vpack.c.bf16 %v1690_v35, %v1688_v11  ;;  %v1562_v4 = vpop.f32.mrb[52].mxu1 }
 0x3a0   : > { %v1563_v13 = vadd.f32 %v1562_v4, %v3616_v1  ;;  %v1564_v42 = vpop.f32.mrb[53].mxu1 }
 0x3a1   : > { %v1565_v14 = vadd.f32 %v1564_v42, %v3620_v60  ;;  %v1566_v61 = vpop.f32.mrb[54].mxu1  ;;  %1966 = vmatprep.mubr.bf16.mxu0 %v1744_v46 }
 0x3a2   : > { %v1567_v57 = vadd.f32 %v1566_v61, %v3616_v1  ;;  %v1568_v43 = vpop.f32.mrb[55].mxu1  ;;  %1967 = vmatmul.mubr.bf16.gmra.mrb[48].mxu0 %v1743_v48  ;;  %v1691_v24 = vmax.f32 %v1563_v13, 0.0 }
 0x3a3   : > { %v1569_v23 = vadd.f32 %v1568_v43, %v3620_v60  ;;  %v1692_v8 = vmax.f32 %v1565_v14, 0.0 }
 0x3a4   : > { %v1693_v33 = vmax.f32 %v1567_v57, 0.0 }
 0x3a5   : > { %v1694_v12 = vmax.f32 %v1569_v23, 0.0 }
 0x3a6   : > { %v1745_v51 = vpack.c.bf16 %v1693_v33, %v1691_v24 }
 0x3a7   : > { %v1746_v41 = vpack.c.bf16 %v1694_v12, %v1692_v8  ;;  %v1572_v25 = vpop.f32.mrb[56].mxu1 }
 0x3a8   : > { %v1573_v7 = vadd.f32 %v1572_v25, %v3616_v1  ;;  %v1574_v16 = vpop.f32.mrb[57].mxu1 }
 0x3a9   : > { %v1575_v59 = vadd.f32 %v1574_v16, %v3620_v60  ;;  %v1576_v20 = vpop.f32.mrb[58].mxu1  ;;  %1974 = vmatprep.mubr.bf16.mxu0 %v1746_v41 }
 0x3aa   : > { %v1577_v2 = vadd.f32 %v1576_v20, %v3616_v1  ;;  %v1578_v28 = vpop.f32.mrb[59].mxu1  ;;  %1975 = vmatmul.mubr.bf16.gmra.mrb[52].mxu0 %v1745_v51  ;;  %v1695_v15 = vmax.f32 %v1573_v7, 0.0 }
 0x3ab   : > { %v1579_v34 = vadd.f32 %v1578_v28, %v3620_v60  ;;  %v1696_v55 = vmax.f32 %v1575_v59, 0.0 }
 0x3ac   : > { %v1697_v18 = vmax.f32 %v1577_v2, 0.0 }
 0x3ad   : > { %v1698_v38 = vmax.f32 %v1579_v34, 0.0 }
 0x3ae   : > { %v1747_v36 = vpack.c.bf16 %v1697_v18, %v1695_v15 }
 0x3af   : > { %v1748_v17 = vpack.c.bf16 %v1698_v38, %v1696_v55  ;;  %v1582_v26 = vpop.f32.mrb[60].mxu1 }
 0x3b0   : > { %v1583_v50 = vadd.f32 %v1582_v26, %v3616_v1  ;;  %v1584_v37 = vpop.f32.mrb[61].mxu1 }
 0x3b1   : > { %v1585_v39 = vadd.f32 %v1584_v37, %v3620_v60  ;;  %v1586_v22 = vpop.f32.mrb[62].mxu1  ;;  %1982 = vmatprep.mubr.bf16.mxu0 %v1748_v17 }
 0x3b2   : > { %v1587_v27 = vadd.f32 %v1586_v22, %v3616_v1  ;;  %v1588_v29 = vpop.f32.mrb[63].mxu1  ;;  %1983 = vmatmul.mubr.bf16.gmra.mrb[56].mxu0 %v1747_v36  ;;  %v1699_v19 = vmax.f32 %v1583_v50, 0.0 }
 0x3b3   : > { %v1589_v9 = vadd.f32 %v1588_v29, %v3620_v60  ;;  %v1700_v52 = vmax.f32 %v1585_v39, 0.0 }
 0x3b4   : > { %v1701_v62 = vmax.f32 %v1587_v27, 0.0 }
 0x3b5   : > { %v1702_v5 = vmax.f32 %v1589_v9, 0.0 }
 0x3b6   : > { %v1749_v45 = vpack.c.bf16 %v1701_v62, %v1699_v19 }
 0x3b7   : > { %v1750_v49 = vpack.c.bf16 %v1702_v5, %v1700_v52  ;;  %v1592_v40 = vpop.f32.mrb[64].mxu1 }
 0x3b8   : > { %v1593_v47 = vadd.f32 %v1592_v40, %v3616_v1  ;;  %v1594_v32 = vpop.f32.mrb[65].mxu1 }
 0x3b9   : > { %v1595_v53 = vadd.f32 %v1594_v32, %v3620_v60  ;;  %v1596_v10 = vpop.f32.mrb[66].mxu1  ;;  %1990 = vmatprep.mubr.bf16.mxu0 %v1750_v49 }
 0x3ba   : > { %v1597_v54 = vadd.f32 %v1596_v10, %v3616_v1  ;;  %v1598_v58 = vpop.f32.mrb[67].mxu1  ;;  %1991 = vmatmul.mubr.bf16.gmra.mrb[60].mxu0 %v1749_v45  ;;  %v1703_v56 = vmax.f32 %v1593_v47, 0.0 }
 0x3bb   : > { %v1599_v44 = vadd.f32 %v1598_v58, %v3620_v60  ;;  %v1704_v0 = vmax.f32 %v1595_v53, 0.0 }
 0x3bc   : > { %v1705_v63 = vmax.f32 %v1597_v54, 0.0 }
 0x3bd   : > { %v1706_v30 = vmax.f32 %v1599_v44, 0.0 }
 0x3be   : > { %v1751_v31 = vpack.c.bf16 %v1705_v63, %v1703_v56 }
 0x3bf   : > { %v1752_v6 = vpack.c.bf16 %v1706_v30, %v1704_v0  ;;  %v1602_v21 = vpop.f32.mrb[68].mxu1 }
 0x3c0   : > { %v1603_v3 = vadd.f32 %v1602_v21, %v3616_v1  ;;  %v1604_v11 = vpop.f32.mrb[69].mxu1 }
 0x3c1   : > { %v1605_v35 = vadd.f32 %v1604_v11, %v3620_v60  ;;  %v1606_v48 = vpop.f32.mrb[70].mxu1  ;;  %1998 = vmatprep.mubr.bf16.mxu0 %v1752_v6 }
 0x3c2   : > { %v1607_v46 = vadd.f32 %v1606_v48, %v3616_v1  ;;  %v1608_v4 = vpop.f32.mrb[71].mxu1  ;;  %1999 = vmatmul.mubr.bf16.gmra.mrb[64].mxu0 %v1751_v31  ;;  %v1707_v42 = vmax.f32 %v1603_v3, 0.0 }
 0x3c3   : > { %v1609_v13 = vadd.f32 %v1608_v4, %v3620_v60  ;;  %v1708_v61 = vmax.f32 %v1605_v35, 0.0 }
 0x3c4   : > { %v1709_v14 = vmax.f32 %v1607_v46, 0.0 }
 0x3c5   : > { %v1710_v57 = vmax.f32 %v1609_v13, 0.0 }
 0x3c6   : > { %v1753_v43 = vpack.c.bf16 %v1709_v14, %v1707_v42 }
 0x3c7   : > { %v1754_v23 = vpack.c.bf16 %v1710_v57, %v1708_v61 }
 0x3c9   : > { %2006 = vmatprep.mubr.bf16.mxu0 %v1754_v23 }
 0x3ca   : > { %2007 = vmatmul.mubr.bf16.gmra.mrb[68].mxu0 %v1753_v43 }
 0x40f   : > { %v1612_v24 = vpop.f32.mrb[72].mxu1 }
 0x410   : > { %v1613_v33 = vadd.f32 %v1612_v24, %v3616_v1  ;;  %v1614_v8 = vpop.f32.mrb[73].mxu1 }
 0x411   : > { %v1615_v12 = vadd.f32 %v1614_v8, %v3620_v60  ;;  %v1616_v51 = vpop.f32.mrb[74].mxu1 }
 0x412   : > { %v1617_v41 = vadd.f32 %v1616_v51, %v3616_v1  ;;  %v1618_v25 = vpop.f32.mrb[75].mxu1  ;;  %v1711_v16 = vmax.f32 %v1613_v33, 0.0 }
 0x413   : > { %v1619_v7 = vadd.f32 %v1618_v25, %v3620_v60  ;;  %v1712_v20 = vmax.f32 %v1615_v12, 0.0 }
 0x414   : > { %v1713_v59 = vmax.f32 %v1617_v41, 0.0 }
 0x415   : > { %v1714_v2 = vmax.f32 %v1619_v7, 0.0 }
 0x416   : > { %v1755_v28 = vpack.c.bf16 %v1713_v59, %v1711_v16 }
 0x417   : > { %v1756_v34 = vpack.c.bf16 %v1714_v2, %v1712_v20  ;;  %v1622_v15 = vpop.f32.mrb[76].mxu1 }
 0x418   : > { %v1623_v18 = vadd.f32 %v1622_v15, %v3616_v1  ;;  %v1624_v55 = vpop.f32.mrb[77].mxu1 }
 0x419   : > { %v1625_v38 = vadd.f32 %v1624_v55, %v3620_v60  ;;  %v1626_v36 = vpop.f32.mrb[78].mxu1  ;;  %2014 = vmatprep.mubr.bf16.mxu0 %v1756_v34 }
 0x41a   : > { %v1627_v17 = vadd.f32 %v1626_v36, %v3616_v1  ;;  %v1628_v26 = vpop.f32.mrb[79].mxu1  ;;  %2015 = vmatmul.mubr.bf16.gmra.mrb[72].mxu0 %v1755_v28  ;;  %v1715_v37 = vmax.f32 %v1623_v18, 0.0 }
 0x41b   : > { %v1629_v50 = vadd.f32 %v1628_v26, %v3620_v60  ;;  %v1716_v22 = vmax.f32 %v1625_v38, 0.0 }
 0x41c   : > { %v1717_v39 = vmax.f32 %v1627_v17, 0.0 }
 0x41d   : > { %v1718_v27 = vmax.f32 %v1629_v50, 0.0 }
 0x41e   : > { %v1757_v29 = vpack.c.bf16 %v1717_v39, %v1715_v37  ;;  %v3689_v39 = vld [vmem:[%s3818_s8] ss:$0 sm:$0xff] }
 0x41f   : > { %v1758_v9 = vpack.c.bf16 %v1718_v27, %v1716_v22  ;;  %v1632_v19 = vpop.f32.mrb[80].mxu1 }
 0x420   : > { %v1633_v62 = vadd.f32 %v1632_v19, %v3616_v1  ;;  %v1634_v52 = vpop.f32.mrb[81].mxu1 }
 0x421   : > { %v1635_v5 = vadd.f32 %v1634_v52, %v3620_v60  ;;  %v1636_v45 = vpop.f32.mrb[82].mxu1  ;;  %2022 = vmatprep.mubr.bf16.mxu0 %v1758_v9 }
 0x422   : > { %v1637_v49 = vadd.f32 %v1636_v45, %v3616_v1  ;;  %v1638_v40 = vpop.f32.mrb[83].mxu1  ;;  %2023 = vmatmul.mubr.bf16.gmra.mrb[76].mxu0 %v1757_v29  ;;  %v1719_v32 = vmax.f32 %v1633_v62, 0.0 }
 0x423   : > { %v1639_v47 = vadd.f32 %v1638_v40, %v3620_v60  ;;  %v1720_v10 = vmax.f32 %v1635_v5, 0.0 }
 0x424   : > { %v1721_v53 = vmax.f32 %v1637_v49, 0.0 }
 0x425   : > { %v1722_v54 = vmax.f32 %v1639_v47, 0.0 }
 0x426   : > { %v1759_v58 = vpack.c.bf16 %v1721_v53, %v1719_v32 }
 0x427   : > { %v1760_v44 = vpack.c.bf16 %v1722_v54, %v1720_v10  ;;  %v1642_v56 = vpop.f32.mrb[84].mxu1 }
 0x428   : > { %v1643_v63 = vadd.f32 %v1642_v56, %v3616_v1  ;;  %v1644_v0 = vpop.f32.mrb[85].mxu1 }
 0x429   : > { %v1645_v30 = vadd.f32 %v1644_v0, %v3620_v60  ;;  %v1646_v31 = vpop.f32.mrb[86].mxu1  ;;  %2030 = vmatprep.mubr.bf16.mxu0 %v1760_v44 }
 0x42a   : > { %v1647_v6 = vadd.f32 %v1646_v31, %v3616_v1  ;;  %v1648_v21 = vpop.f32.mrb[87].mxu1  ;;  %2031 = vmatmul.mubr.bf16.gmra.mrb[80].mxu0 %v1759_v58  ;;  %v1723_v11 = vmax.f32 %v1643_v63, 0.0 }
 0x42b   : > { %v1649_v3 = vadd.f32 %v1648_v21, %v3620_v60  ;;  %v1724_v48 = vmax.f32 %v1645_v30, 0.0 }
 0x42c   : > { %v1725_v35 = vmax.f32 %v1647_v6, 0.0 }
 0x42d   : > { %v1726_v46 = vmax.f32 %v1649_v3, 0.0 }
 0x42e   : > { %v1761_v4 = vpack.c.bf16 %v1725_v35, %v1723_v11 }
 0x42f   : > { %v1762_v13 = vpack.c.bf16 %v1726_v46, %v1724_v48  ;;  %v1652_v42 = vpop.f32.mrb[88].mxu1 }
 0x430   : > { %v1653_v14 = vadd.f32 %v1652_v42, %v3616_v1  ;;  %v1654_v61 = vpop.f32.mrb[89].mxu1 }
 0x431   : > { %v1655_v57 = vadd.f32 %v1654_v61, %v3620_v60  ;;  %v1656_v43 = vpop.f32.mrb[90].mxu1  ;;  %2038 = vmatprep.mubr.bf16.mxu0 %v1762_v13 }
 0x432   : > { %v1657_v23 = vadd.f32 %v1656_v43, %v3616_v1  ;;  %v1658_v24 = vpop.f32.mrb[91].mxu1  ;;  %2039 = vmatmul.mubr.bf16.gmra.mrb[84].mxu0 %v1761_v4  ;;  %v1727_v8 = vmax.f32 %v1653_v14, 0.0 }
 0x433   : > { %v1659_v33 = vadd.f32 %v1658_v24, %v3620_v60  ;;  %v1728_v51 = vmax.f32 %v1655_v57, 0.0 }
 0x434   : > { %v1729_v12 = vmax.f32 %v1657_v23, 0.0 }
 0x435   : > { %v1730_v41 = vmax.f32 %v1659_v33, 0.0 }
 0x436   : > { %v1763_v25 = vpack.c.bf16 %v1729_v12, %v1727_v8 }
 0x437   : > { %v1764_v7 = vpack.c.bf16 %v1730_v41, %v1728_v51  ;;  %v1662_v16 = vpop.f32.mrb[92].mxu1 }
 0x438   : > { %v1663_v59 = vadd.f32 %v1662_v16, %v3616_v1  ;;  %v1664_v20 = vpop.f32.mrb[93].mxu1 }
 0x439   : > { %v1665_v2 = vadd.f32 %v1664_v20, %v3620_v60  ;;  %v1666_v28 = vpop.f32.mrb[94].mxu1  ;;  %2046 = vmatprep.mubr.bf16.mxu0 %v1764_v7 }
 0x43a   : > { %v1667_v34 = vadd.f32 %v1666_v28, %v3616_v1  ;;  %v1668_v15 = vpop.f32.mrb[95].mxu1  ;;  %2047 = vmatmul.mubr.bf16.gmra.mrb[88].mxu0 %v1763_v25  ;;  %v1731_v55 = vmax.f32 %v1663_v59, 0.0 }
 0x43b   : > { %v1669_v18 = vadd.f32 %v1668_v15, %v3620_v60  ;;  %v1732_v36 = vmax.f32 %v1665_v2, 0.0 }
 0x43c   : > { %v1733_v38 = vmax.f32 %v1667_v34, 0.0 }
 0x43d   : > { %v1734_v17 = vmax.f32 %v1669_v18, 0.0 }
 0x43e   : > { %v1765_v26 = vpack.c.bf16 %v1733_v38, %v1731_v55 }
 0x43f   : > { %v1766_v50 = vpack.c.bf16 %v1734_v17, %v1732_v36 }
 0x441   : > { %2054 = vmatprep.mubr.bf16.mxu0 %v1766_v50 }
 0x442   : > { %2055 = vmatmul.mubr.bf16.gmra.mrb[92].mxu0 %v1765_v26 }
 0x455   : > { %v2316_v37 = vpop.f32.mrb[32].mxu0 }
 0x456   : > { %v2317_v1 = vpop.f32.mrb[33].mxu0 }
 0x457   : > { %v2318_v22 = vadd.f32 %v2317_v1, %v2316_v37  ;;  %v2319_v27 = vpop.f32.mrb[34].mxu0 }
 0x458   : > { %v2320_v29 = vpop.f32.mrb[35].mxu0 }
 0x459   : > { %v1937_v60 = vadd.f32 %v2318_v22, %v3689_v39  ;;  %v2321_v9 = vadd.f32 %v2320_v29, %v2319_v27 }
 0x45b   : > { %2063 = vst [vmem:[%s3694_s19] sm:$0xff] %v1937_v60  ;;  %v1940_v19 = vadd.f32 %v2321_v9, %v3689_v39 }
 0x45d   : > { %2064 = vst [vmem:[%s3694_s19 + $0x8] sm:$0xff] %v1940_v19  ;;  %v2322_v62 = vpop.f32.mrb[36].mxu0 }
 0x45e   : > { %v2323_v52 = vpop.f32.mrb[37].mxu0 }
 0x45f   : > { %v2324_v5 = vadd.f32 %v2323_v52, %v2322_v62  ;;  %v2325_v45 = vpop.f32.mrb[38].mxu0 }
 0x460   : > { %v2326_v49 = vpop.f32.mrb[39].mxu0 }
 0x461   : > { %v1945_v40 = vadd.f32 %v2324_v5, %v3689_v39  ;;  %v2327_v47 = vadd.f32 %v2326_v49, %v2325_v45 }
 0x463   : > { %2065 = vst [vmem:[%s3694_s19 + $0x10] sm:$0xff] %v1945_v40  ;;  %v1948_v32 = vadd.f32 %v2327_v47, %v3689_v39 }
 0x465   : > { %2066 = vst [vmem:[%s3694_s19 + $0x18] sm:$0xff] %v1948_v32  ;;  %v2328_v53 = vpop.f32.mrb[40].mxu0 }
 0x466   : > { %v2329_v10 = vpop.f32.mrb[41].mxu0 }
 0x467   : > { %v2330_v54 = vadd.f32 %v2329_v10, %v2328_v53  ;;  %v2331_v58 = vpop.f32.mrb[42].mxu0 }
 0x468   : > { %v2332_v44 = vpop.f32.mrb[43].mxu0 }
 0x469   : > { %v1953_v56 = vadd.f32 %v2330_v54, %v3689_v39  ;;  %v2333_v63 = vadd.f32 %v2332_v44, %v2331_v58 }
 0x46b   : > { %2067 = vst [vmem:[%s3694_s19 + $0x20] sm:$0xff] %v1953_v56  ;;  %v1956_v0 = vadd.f32 %v2333_v63, %v3689_v39 }
 0x46d   : > { %2068 = vst [vmem:[%s3694_s19 + $0x28] sm:$0xff] %v1956_v0  ;;  %v2334_v30 = vpop.f32.mrb[44].mxu0 }
 0x46e   : > { %v2335_v31 = vpop.f32.mrb[45].mxu0 }
 0x46f   : > { %v2336_v6 = vadd.f32 %v2335_v31, %v2334_v30  ;;  %v2337_v21 = vpop.f32.mrb[46].mxu0 }
 0x470   : > { %v2338_v3 = vpop.f32.mrb[47].mxu0 }
 0x471   : > { %v1961_v11 = vadd.f32 %v2336_v6, %v3689_v39  ;;  %v2339_v35 = vadd.f32 %v2338_v3, %v2337_v21 }
 0x473   : > { %2069 = vst [vmem:[%s3694_s19 + $0x30] sm:$0xff] %v1961_v11  ;;  %v1964_v48 = vadd.f32 %v2339_v35, %v3689_v39 }
 0x475   : > { %2070 = vst [vmem:[%s3694_s19 + $0x38] sm:$0xff] %v1964_v48  ;;  %v2340_v46 = vpop.f32.mrb[48].mxu0 }
 0x476   : > { %v2341_v4 = vpop.f32.mrb[49].mxu0 }
 0x477   : > { %v2342_v13 = vadd.f32 %v2341_v4, %v2340_v46  ;;  %v2343_v42 = vpop.f32.mrb[50].mxu0 }
 0x478   : > { %v2344_v14 = vpop.f32.mrb[51].mxu0 }
 0x479   : > { %v1969_v61 = vadd.f32 %v2342_v13, %v3689_v39  ;;  %v2345_v57 = vadd.f32 %v2344_v14, %v2343_v42 }
 0x47b   : > { %2071 = vst [vmem:[%s3694_s19 + $0x40] sm:$0xff] %v1969_v61  ;;  %v1972_v43 = vadd.f32 %v2345_v57, %v3689_v39 }
 0x47d   : > { %2072 = vst [vmem:[%s3694_s19 + $0x48] sm:$0xff] %v1972_v43  ;;  %v2346_v23 = vpop.f32.mrb[52].mxu0 }
 0x47e   : > { %v2347_v24 = vpop.f32.mrb[53].mxu0 }
 0x47f   : > { %v2348_v33 = vadd.f32 %v2347_v24, %v2346_v23  ;;  %v2349_v8 = vpop.f32.mrb[54].mxu0 }
 0x480   : > { %v2350_v12 = vpop.f32.mrb[55].mxu0 }
 0x481   : > { %v1977_v51 = vadd.f32 %v2348_v33, %v3689_v39  ;;  %v2351_v41 = vadd.f32 %v2350_v12, %v2349_v8 }
 0x483   : > { %2073 = vst [vmem:[%s3694_s19 + $0x50] sm:$0xff] %v1977_v51  ;;  %v1980_v25 = vadd.f32 %v2351_v41, %v3689_v39 }
 0x485   : > { %2074 = vst [vmem:[%s3694_s19 + $0x58] sm:$0xff] %v1980_v25  ;;  %v2352_v7 = vpop.f32.mrb[56].mxu0 }
 0x486   : > { %v2353_v16 = vpop.f32.mrb[57].mxu0 }
 0x487   : > { %v2354_v59 = vadd.f32 %v2353_v16, %v2352_v7  ;;  %v2355_v20 = vpop.f32.mrb[58].mxu0 }
 0x488   : > { %v2356_v2 = vpop.f32.mrb[59].mxu0 }
 0x489   : > { %v1985_v28 = vadd.f32 %v2354_v59, %v3689_v39  ;;  %v2357_v34 = vadd.f32 %v2356_v2, %v2355_v20 }
 0x48b   : > { %2075 = vst [vmem:[%s3694_s19 + $0x60] sm:$0xff] %v1985_v28  ;;  %v1988_v15 = vadd.f32 %v2357_v34, %v3689_v39 }
 0x48d   : > { %2076 = vst [vmem:[%s3694_s19 + $0x68] sm:$0xff] %v1988_v15  ;;  %v2358_v18 = vpop.f32.mrb[60].mxu0 }
 0x48e   : > { %v2359_v55 = vpop.f32.mrb[61].mxu0 }
 0x48f   : > { %v2360_v38 = vadd.f32 %v2359_v55, %v2358_v18  ;;  %v2361_v36 = vpop.f32.mrb[62].mxu0 }
 0x490   : > { %v2362_v17 = vpop.f32.mrb[63].mxu0 }
 0x491   : > { %v1993_v26 = vadd.f32 %v2360_v38, %v3689_v39  ;;  %v2363_v50 = vadd.f32 %v2362_v17, %v2361_v36 }
 0x493   : > { %2077 = vst [vmem:[%s3694_s19 + $0x70] sm:$0xff] %v1993_v26  ;;  %v1996_v37 = vadd.f32 %v2363_v50, %v3689_v39 }
 0x495   : > { %2078 = vst [vmem:[%s3694_s19 + $0x78] sm:$0xff] %v1996_v37  ;;  %v2364_v1 = vpop.f32.mrb[64].mxu0 }
 0x496   : > { %v2365_v22 = vpop.f32.mrb[65].mxu0 }
 0x497   : > { %v2366_v27 = vadd.f32 %v2365_v22, %v2364_v1  ;;  %v2367_v29 = vpop.f32.mrb[66].mxu0 }
 0x498   : > { %v2368_v60 = vpop.f32.mrb[67].mxu0 }
 0x499   : > { %v2001_v9 = vadd.f32 %v2366_v27, %v3689_v39  ;;  %v2369_v19 = vadd.f32 %v2368_v60, %v2367_v29 }
 0x49b   : > { %2079 = vst [vmem:[%s3694_s19 + $0x80] sm:$0xff] %v2001_v9  ;;  %v2004_v62 = vadd.f32 %v2369_v19, %v3689_v39 }
 0x49d   : > { %2080 = vst [vmem:[%s3694_s19 + $0x88] sm:$0xff] %v2004_v62  ;;  %v2370_v52 = vpop.f32.mrb[68].mxu0 }
 0x49e   : > { %v2371_v5 = vpop.f32.mrb[69].mxu0 }
 0x49f   : > { %v2372_v45 = vadd.f32 %v2371_v5, %v2370_v52  ;;  %v2373_v49 = vpop.f32.mrb[70].mxu0 }
 0x4a0   : > { %v2374_v40 = vpop.f32.mrb[71].mxu0 }
 0x4a1   : > { %v2009_v47 = vadd.f32 %v2372_v45, %v3689_v39  ;;  %v2375_v32 = vadd.f32 %v2374_v40, %v2373_v49 }
 0x4a3   : > { %2081 = vst [vmem:[%s3694_s19 + $0x90] sm:$0xff] %v2009_v47  ;;  %v2012_v53 = vadd.f32 %v2375_v32, %v3689_v39 }
 0x4a5   : > { %2082 = vst [vmem:[%s3694_s19 + $0x98] sm:$0xff] %v2012_v53 }
 0x4ed   : > { %v2376_v10 = vpop.f32.mrb[72].mxu0 }
 0x4ee   : > { %v2377_v54 = vpop.f32.mrb[73].mxu0 }
 0x4ef   : > { %v2378_v58 = vadd.f32 %v2377_v54, %v2376_v10  ;;  %v2379_v44 = vpop.f32.mrb[74].mxu0 }
 0x4f0   : > { %v2380_v56 = vpop.f32.mrb[75].mxu0 }
 0x4f1   : > { %v2017_v63 = vadd.f32 %v2378_v58, %v3689_v39  ;;  %v2381_v0 = vadd.f32 %v2380_v56, %v2379_v44 }
 0x4f3   : > { %2083 = vst [vmem:[%s3694_s19 + $0xa0] sm:$0xff] %v2017_v63  ;;  %v2020_v30 = vadd.f32 %v2381_v0, %v3689_v39 }
 0x4f5   : > { %2084 = vst [vmem:[%s3694_s19 + $0xa8] sm:$0xff] %v2020_v30  ;;  %v2382_v31 = vpop.f32.mrb[76].mxu0 }
 0x4f6   : > { %v2383_v6 = vpop.f32.mrb[77].mxu0 }
 0x4f7   : > { %v2384_v21 = vadd.f32 %v2383_v6, %v2382_v31  ;;  %v2385_v3 = vpop.f32.mrb[78].mxu0 }
 0x4f8   : > { %v2386_v11 = vpop.f32.mrb[79].mxu0 }
 0x4f9   : > { %v2025_v35 = vadd.f32 %v2384_v21, %v3689_v39  ;;  %v2387_v48 = vadd.f32 %v2386_v11, %v2385_v3 }
 0x4fb   : > { %2085 = vst [vmem:[%s3694_s19 + $0xb0] sm:$0xff] %v2025_v35  ;;  %v2028_v46 = vadd.f32 %v2387_v48, %v3689_v39 }
 0x4fd   : > { %2086 = vst [vmem:[%s3694_s19 + $0xb8] sm:$0xff] %v2028_v46  ;;  %v2388_v4 = vpop.f32.mrb[80].mxu0 }
 0x4fe   : > { %v2389_v13 = vpop.f32.mrb[81].mxu0 }
 0x4ff   : > { %v2390_v42 = vadd.f32 %v2389_v13, %v2388_v4  ;;  %v2391_v14 = vpop.f32.mrb[82].mxu0 }
 0x500   : > { %v2392_v61 = vpop.f32.mrb[83].mxu0 }
 0x501   : > { %v2033_v57 = vadd.f32 %v2390_v42, %v3689_v39  ;;  %v2393_v43 = vadd.f32 %v2392_v61, %v2391_v14 }
 0x503   : > { %2087 = vst [vmem:[%s3694_s19 + $0xc0] sm:$0xff] %v2033_v57  ;;  %v2036_v23 = vadd.f32 %v2393_v43, %v3689_v39 }
 0x505   : > { %2088 = vst [vmem:[%s3694_s19 + $0xc8] sm:$0xff] %v2036_v23  ;;  %v2394_v24 = vpop.f32.mrb[84].mxu0 }
 0x506   : > { %v2395_v33 = vpop.f32.mrb[85].mxu0 }
 0x507   : > { %v2396_v8 = vadd.f32 %v2395_v33, %v2394_v24  ;;  %v2397_v12 = vpop.f32.mrb[86].mxu0 }
 0x508   : > { %v2398_v51 = vpop.f32.mrb[87].mxu0 }
 0x509   : > { %v2041_v41 = vadd.f32 %v2396_v8, %v3689_v39  ;;  %v2399_v25 = vadd.f32 %v2398_v51, %v2397_v12 }
 0x50b   : > { %2089 = vst [vmem:[%s3694_s19 + $0xd0] sm:$0xff] %v2041_v41  ;;  %v2044_v7 = vadd.f32 %v2399_v25, %v3689_v39 }
 0x50d   : > { %2090 = vst [vmem:[%s3694_s19 + $0xd8] sm:$0xff] %v2044_v7  ;;  %v2400_v16 = vpop.f32.mrb[88].mxu0 }
 0x50e   : > { %v2401_v59 = vpop.f32.mrb[89].mxu0 }
 0x50f   : > { %v2402_v20 = vadd.f32 %v2401_v59, %v2400_v16  ;;  %v2403_v2 = vpop.f32.mrb[90].mxu0 }
 0x510   : > { %v2404_v28 = vpop.f32.mrb[91].mxu0 }
 0x511   : > { %v2049_v34 = vadd.f32 %v2402_v20, %v3689_v39  ;;  %v2405_v15 = vadd.f32 %v2404_v28, %v2403_v2 }
 0x513   : > { %2091 = vst [vmem:[%s3694_s19 + $0xe0] sm:$0xff] %v2049_v34  ;;  %v2052_v18 = vadd.f32 %v2405_v15, %v3689_v39 }
 0x515   : > { %2092 = vst [vmem:[%s3694_s19 + $0xe8] sm:$0xff] %v2052_v18  ;;  %v2406_v55 = vpop.f32.mrb[92].mxu0 }
 0x516   : > { %v2407_v38 = vpop.f32.mrb[93].mxu0 }
 0x517   : > { %v2408_v36 = vadd.f32 %v2407_v38, %v2406_v55  ;;  %v2409_v17 = vpop.f32.mrb[94].mxu0 }
 0x518   : > { %v2410_v26 = vpop.f32.mrb[95].mxu0 }
 0x519   : > { %v2057_v50 = vadd.f32 %v2408_v36, %v3689_v39  ;;  %v2411_v37 = vadd.f32 %v2410_v26, %v2409_v17 }
 0x51b   : > { %2093 = vst [vmem:[%s3694_s19 + $0xf0] sm:$0xff] %v2057_v50  ;;  %v2060_v1 = vadd.f32 %v2411_v37, %v3689_v39 }
 0x51d   : > { %2094 = vst [vmem:[%s3694_s19 + $0xf8] sm:$0xff] %v2060_v1 }
 0x51e   : > { %2791 = shalt.err (!%p2788_p4)
}
 0x51f   : > { %s2792_s20 = scalar_lea.hbm %s3761_s25, 4096  ;;  %s2796_s19 = scalar_lea.hbm %s3843_s17, 8192 }
 0x520   : > { %p2793_p9 = scmp.ne.s32.totalorder %s3761_s25, %s2792_s20  ;;  %p2797_p8 = scmp.lt.u32.totalorder %s3761_s25, %s3843_s17 }
 0x521   : > { %p2798_p13 = scmp.lt.u32.totalorder %s2796_s19, %s2792_s20  ;;  %p2800_p10 = scmp.lt.u32.totalorder %s2792_s20, %s3761_s25 }
 0x522   : > { %p2794_p0 = pnand %p2793_p9, %p3067_p5 }
 0x523   : > { %p2799_p6 = por %p2798_p13, %p2797_p8 }
 0x524   : > { %p2795_p11 = pneg %p2794_p0 }
 0x525   : > { %p2801_p3 = por %p2800_p10, %p2799_p6 }
 0x527   : > { %p2802_p7 = pnand %p2801_p3, %p2795_p11 }
 0x529   : > { %2805 = shalt.err (!%p2802_p7)
}
 0x52a   : > { %s2864_s15 = smov 128   ;;  %s2865_s26 = smov 8  }
 0x52b   : > { %2442 = dma.vmem_to_hbm [thread:$0]  (%p3067_p5), %s3763_s14, 4096, %s3761_s25, %s2096_s13, %s2864_s15, %s2864_s15, %s2865_s26  }
 0x52c PF: > { %s3844_s22 = sld [smem:[#allocation15_spill]]  ;;  %s3845_s9 = sld [smem:[#allocation16_spill]] }
 0x52d   : > { %p3847_p1 = scmp.ge.s32.totalorder %s2852_s12, 2 }
 0x532   : > { %s2124_s27 = sand.u32 1, %s3844_s22   ;;  %p3846_p12 = scmp.ne.s32.totalorder %s3845_s9, 0 }
 0x533   : > { %s2125_s20 = scalar_lea.sflag [#allocation4], %s2124_s27 }
 0x534   : > { %p2459_p2 = pnand %p3847_p1, %p3846_p12 }
 0x536   : > { %2835 = dma.done.wait (!%p2459_p2), %s2125_s20, 4096  }
 0x537   : > { %2837 = vsyncadd (!%p2459_p2), %s2125_s20, 4294963200  ;;  %p24_p4 = scmp.ge.s32.totalorder %s3053_s16, 4   ;;  %s3848_s30 = smov %s2844_s10 }
 0x538   : > { %s3849_s10 = smov %s2848_s11  ;;  %s3850_s11 = smov %s3063_s29 }
 0x539   : > { %s3851_s12 = smov %s3053_s16  ;;  %26 = sbr.rel (!%p24_p4) target bundleno = 9 (0x9), region = 113 }
 0x540   :  { %2130 = vsyncpa [#allocation3], 1 }
 0x541   :  { %2132 = vsyncpa [#allocation3 + $0x1], 1 }
 0x542   :  { %2133 = vsyncpa [#allocation6], 1 }
 0x543   :  { %2134 = vsyncpa [#allocation9], 1 }
 0x544   :  { %2135 = vsyncpa [#allocation4], 1 }
 0x545   :  { %2137 = vsyncpa [#allocation4 + $0x1], 1 }

</bundles_post_ra>
